<compile_context>
chip_gen: v7x
topology: tpu7x:2x2x1
jax: 0.10.0
libtpu: 0.0.40
codegen_flags: <defaults>
</compile_context>

<pallas_src>
import jax
import jax.numpy as jnp
from jax.experimental import pallas as pl
from jax.experimental.pallas import tpu as pltpu


# ----------------------------------------------------------------------------
# Per-generation VMEM budgeting.
# ----------------------------------------------------------------------------
def _round_up(x, m):
    return ((x + m - 1) // m) * m


def _vmem_limits():
    """Returns (physical VMEM bytes, per-layer live working-set budget)."""
    try:
        phys = int(pltpu.get_tpu_info().vmem_capacity_bytes)
    except Exception:
        phys = 64 << 20                      # conservative: v7x per-TensorCore VMEM
    # ~3/8 of physical leaves headroom for double-buffered outputs / compiler temps:
    #   v7x (64 MiB) -> 24 MiB target,  v5e/v6e (128 MiB) -> 48 MiB target.
    return phys, max(16 << 20, (phys * 3) // 8)


def _conv_vmem_bytes(th, w, cin, cout, apply_pool, n_caps):
    """Rough live-VMEM estimate for one H-strip of the fused conv kernel."""
    cin_l = _round_up(cin, 128)              # lane-layout padding of the last dim
    cout_l = _round_up(cout, 128)
    xp = (th + 2) * _round_up(w + 2, 8) * cin_l * 2          # padded bf16 input strip
    wts = 9 * cin * cout_l * 2                               # single-buffered weights
    acc = 2 * th * w * cout_l * 4                            # f32 accumulator + epilogue
    tho, wo = (th // 2, w // 2) if apply_pool else (th, w)
    outs = 2 * tho * _round_up(wo, 8) * cout_l * 2           # double-buffered main out
    caps = n_caps * 2 * th * _round_up(w, 8) * cout_l * 2    # double-buffered captures
    return xp + wts + acc + outs + caps


def _pick_strip_height(h, w, cin, cout, apply_pool, n_caps, budget):
    cands = [d for d in range(h, 0, -1) if h % d == 0]
    if apply_pool:
        cands = [d for d in cands if d % 2 == 0] or [h]
    for d in cands:
        if _conv_vmem_bytes(d, w, cin, cout, apply_pool, n_caps) <= budget:
            return d
    # TODO(synk): add W tiling for resolutions where even the thinnest strip overflows VMEM.
    return cands[-1]


# pl.Buffered(1) support probe: flipped off (and not retried) on first failure.
_USE_BUFFERED_WEIGHTS = [True]


# ----------------------------------------------------------------------------
# Fused strip-tiled conv3x3 (+bias, +ReLU, +2x2 maxpool) kernel factory.
# ----------------------------------------------------------------------------
def _make_conv_strip_kernel(w, th, cin, cout, apply_relu, apply_pool,
                            capture_pre, capture_mid):
    """Outputs (in order): main (pooled if apply_pool else full-res activation),
    then optionally the pre-ReLU conv output, then optionally the post-ReLU
    pre-pool tensor.  Scratch: bf16 VMEM padded strip + 3 DMA semaphores."""
    n_out = 1 + int(capture_pre) + int(capture_mid)
    hw = th * w

    def kernel(x_hbm, w_ref, b_ref, *refs):
        out_refs = refs[:n_out]
        xp = refs[n_out]                      # (th+2, w+2, cin) bf16 VMEM scratch
        sem = refs[n_out + 1]                 # DMA semaphores (3,)
        out_dtype = out_refs[0].dtype

        bi = pl.program_id(0)
        si = pl.program_id(1)
        row0 = si * th
        is_first = si == 0
        is_last = si == pl.num_programs(1) - 1
        not_last = si < pl.num_programs(1) - 1

        # ---- stage the zero-padded input strip (1-pixel halo) into VMEM -----
        body = pltpu.make_async_copy(x_hbm.at[bi, pl.ds(row0, th)],
                                     xp.at[pl.ds(1, th), pl.ds(1, w)],
                                     sem.at[0])
        body.start()

        # Halo columns are never DMAed -> zero them (overlaps with the DMA).
        xp[:, pl.ds(0, 1), :] = jnp.zeros((th + 2, 1, cin), xp.dtype)
        xp[:, pl.ds(w + 1, 1), :] = jnp.zeros((th + 2, 1, cin), xp.dtype)

        @pl.when(si > 0)
        def _():
            pltpu.make_async_copy(x_hbm.at[bi, pl.ds(row0 - 1, 1)],
                                  xp.at[pl.ds(0, 1), pl.ds(1, w)],
                                  sem.at[1]).start()

        @pl.when(is_first)
        def _():
            xp[pl.ds(0, 1)] = jnp.zeros((1, w + 2, cin), xp.dtype)

        @pl.when(not_last)
        def _():
            pltpu.make_async_copy(x_hbm.at[bi, pl.ds(row0 + th, 1)],
                                  xp.at[pl.ds(th + 1, 1), pl.ds(1, w)],
                                  sem.at[2]).start()

        @pl.when(is_last)
        def _():
            xp[pl.ds(th + 1, 1)] = jnp.zeros((1, w + 2, cin), xp.dtype)

        # TODO(synk): double-buffer the strip DMA (prefetch strip s+1) to hide the
        # input fetch behind the MXU work on the memory-bound early layers.
        body.wait()

        @pl.when(si > 0)
        def _():
            pltpu.make_async_copy(x_hbm.at[bi, pl.ds(0, 1)],
                                  xp.at[pl.ds(0, 1), pl.ds(1, w)],
                                  sem.at[1]).wait()

        @pl.when(not_last)
        def _():
            pltpu.make_async_copy(x_hbm.at[bi, pl.ds(0, 1)],
                                  xp.at[pl.ds(th + 1, 1), pl.ds(1, w)],
                                  sem.at[2]).wait()

        # ---- 3x3 conv = 9 shifted (hw, cin) @ (cin, cout) MXU matmuls --------
        # f32 value-chain accumulation: no VMEM scratch round-trip between taps.
        acc = None
        t = 0
        for dy in range(3):
            for dx in range(3):
                win = xp[pl.ds(dy, th), pl.ds(dx, w), :].reshape(hw, cin)
                part = jnp.dot(win, w_ref[t], preferred_element_type=jnp.float32)
                acc = part if acc is None else acc + part
                t += 1

        # ---- f32 epilogue: bias [+ReLU] [+pool], single cast at the store ----
        pre = (acc + b_ref[...]).reshape(th, w, cout)
        k = 1
        if capture_pre:                       # pre-ReLU conv output (torch layer i)
            out_refs[k][0] = pre.astype(out_dtype)
            k += 1
        act = jnp.maximum(pre, 0.0) if apply_relu else pre
        if capture_mid:                       # post-ReLU, pre-pool (torch layer i+1)
            out_refs[k][0] = act.astype(out_dtype)
            k += 1
        if apply_pool:
            # TODO(synk): switch to pairwise strided-slice max (VPU-only) once
            # lax.slice-with-strides lowering is confirmed on all target generations.
            p = jnp.max(act.reshape(th, w // 2, 2, cout), axis=2)
            p = jnp.max(p.reshape(th // 2, 2, w // 2, cout), axis=1)
            out_refs[0][0] = p.astype(out_dtype)
        else:
            out_refs[0][0] = act.astype(out_dtype)

    return kernel


def conv_block(x, w, b, *, apply_relu, apply_pool, capture_pre, capture_mid,
               phys_vmem, vmem_budget, strip=None):
    """x: (N,H,W,Cin) bf16,  w: (9, Cin, Cout) bf16,  b: (Cout,) f32."""
    n, h, wd, cin = x.shape
    cout = w.shape[-1]
    if apply_pool:
        assert h % 2 == 0 and wd % 2 == 0, "2x2 maxpool needs even spatial dims"
    n_caps = int(capture_pre) + int(capture_mid)
    th = strip if strip is not None else _pick_strip_height(
        h, wd, cin, cout, apply_pool, n_caps, vmem_budget)
    assert h % th == 0 and (not apply_pool or th % 2 == 0)
    n_strips = h // th
    tho, wo = (th // 2, wd // 2) if apply_pool else (th, wd)
    ho = h // 2 if apply_pool else h

    out_shape = [jax.ShapeDtypeStruct((n, ho, wo, cout), x.dtype)]
    out_specs = [pl.BlockSpec((1, tho, wo, cout), lambda bi, si: (bi, si, 0, 0))]
    # TODO(synk): store cout=64 layers lane-dense (fold 2 of W into channels, last dim
    # 128) to avoid masked vst on the largest-byte-volume (conv1) activations.
    for _ in range(n_caps):
        out_shape.append(jax.ShapeDtypeStruct((n, h, wd, cout), x.dtype))
        out_specs.append(pl.BlockSpec((1, th, wd, cout), lambda bi, si: (bi, si, 0, 0)))

    est = _conv_vmem_bytes(th, wd, cin, cout, apply_pool, n_caps)
    limit = int(min(phys_vmem, max(2 * est + (8 << 20), 32 << 20)))

    kernel = _make_conv_strip_kernel(wd, th, cin, cout, apply_relu, apply_pool,
                                     capture_pre, capture_mid)

    # TODO(synk): fuse consecutive convs of a VGG block into one pallas_call (keep the
    # activation in VMEM, stream next-layer weights) for small/medium resolutions.
    def _run(single_buffer_weights):
        if single_buffer_weights:
            w_spec = pl.BlockSpec((9, cin, cout), lambda bi, si: (0, 0, 0),
                                  pipeline_mode=pl.Buffered(1))   # constant block
        else:
            w_spec = pl.BlockSpec((9, cin, cout), lambda bi, si: (0, 0, 0))
        return pl.pallas_call(
            kernel,
            out_shape=tuple(out_shape),
            grid=(n, n_strips),
            in_specs=[
                pl.BlockSpec(memory_space=pl.ANY),   # x stays in HBM; strip DMAed in-kernel
                w_spec,
                pl.BlockSpec((1, cout), lambda bi, si: (0, 0)),
            ],
            out_specs=tuple(out_specs),
            scratch_shapes=[pltpu.VMEM((th + 2, wd + 2, cin), x.dtype),
                            pltpu.SemaphoreType.DMA((3,))],
            compiler_params=pltpu.CompilerParams(
                dimension_semantics=("parallel", "parallel"),
                vmem_limit_bytes=limit),
        )(x, w, b.reshape(1, cout))

    if _USE_BUFFERED_WEIGHTS[0]:
        try:
            outs = _run(True)
        except Exception:
            _USE_BUFFERED_WEIGHTS[0] = False
            outs = _run(False)
    else:
        outs = _run(False)
    if not isinstance(outs, (tuple, list)):
        outs = (outs,)
    return tuple(outs)


# ----------------------------------------------------------------------------
# Dedicated layer-0 path (Cin=3): wrapper-side K=27 im2col + one matmul per strip.
# ----------------------------------------------------------------------------
def _make_conv0_kernel(th, w, k, cout, apply_relu, capture_pre):
    hw = th * w

    def kernel(x_ref, w_ref, b_ref, *out_refs):
        out_dtype = out_refs[0].dtype
        xm = x_ref[0].reshape(hw, k)
        acc = jnp.dot(xm, w_ref[...], preferred_element_type=jnp.float32)
        pre = (acc + b_ref[...]).reshape(th, w, cout)
        if capture_pre:
            out_refs[1][0] = pre.astype(out_dtype)
        act = jnp.maximum(pre, 0.0) if apply_relu else pre
        out_refs[0][0] = act.astype(out_dtype)

    return kernel


def conv_first_block(x_nhwc, w, b, *, apply_relu, capture_pre, phys_vmem, vmem_budget):
    """Layer-0 conv (Cin=3): lane-dense-ish K=27 im2col avoids the 3-lane layout
    that wastes ~42x VMEM; the input strip is then regular-BlockSpec pipelined."""
    n, h, wd, cin = x_nhwc.shape
    cout = w.shape[-1]
    k = 9 * cin
    xp = jnp.pad(x_nhwc, ((0, 0), (1, 1), (1, 1), (0, 0)))
    cols = [xp[:, dy:dy + h, dx:dx + wd, :] for dy in range(3) for dx in range(3)]
    x27 = jnp.concatenate(cols, axis=-1)                 # (N, H, W, 27)

    cout_l = _round_up(cout, 128)

    def bytes_for(th):
        xin = 2 * th * wd * _round_up(k, 128) * 2        # double-buffered input strip
        out = 2 * th * wd * cout_l * 2
        acc = 2 * th * wd * cout_l * 4
        cap = (2 * th * wd * cout_l * 2) if capture_pre else 0
        return xin + out + acc + cap + k * cout * 2

    cands = [d for d in range(h, 0, -1) if h % d == 0]
    th = next((d for d in cands if bytes_for(d) <= vmem_budget), cands[-1])
    n_strips = h // th
    limit = int(min(phys_vmem, max(2 * bytes_for(th) + (8 << 20), 32 << 20)))

    out_shape = [jax.ShapeDtypeStruct((n, h, wd, cout), x_nhwc.dtype)]
    out_specs = [pl.BlockSpec((1, th, wd, cout), lambda bi, si: (bi, si, 0, 0))]
    if capture_pre:
        out_shape.append(jax.ShapeDtypeStruct((n, h, wd, cout), x_nhwc.dtype))
        out_specs.append(pl.BlockSpec((1, th, wd, cout), lambda bi, si: (bi, si, 0, 0)))

    outs = pl.pallas_call(
        _make_conv0_kernel(th, wd, k, cout, apply_relu, capture_pre),
        out_shape=tuple(out_shape),
        grid=(n, n_strips),
        in_specs=[
            pl.BlockSpec((1, th, wd, k), lambda bi, si: (bi, si, 0, 0)),
            pl.BlockSpec((k, cout), lambda bi, si: (0, 0)),
            pl.BlockSpec((1, cout), lambda bi, si: (0, 0)),
        ],
        out_specs=tuple(out_specs),
        compiler_params=pltpu.CompilerParams(
            dimension_semantics=("parallel", "parallel"),
            vmem_limit_bytes=limit),
    )(x27, w.reshape(k, cout), b.reshape(1, cout))
    if not isinstance(outs, (tuple, list)):
        outs = (outs,)
    return tuple(outs)


# ----------------------------------------------------------------------------
# Standalone ReLU / MaxPool kernels (only used if relu/pool is not fused with a
# preceding conv; never hit for VGG19.features[:29]).
# ----------------------------------------------------------------------------
def _relu_kernel(x_ref, o_ref):
    o_ref[...] = jnp.maximum(x_ref[...], 0).astype(o_ref.dtype)


def relu(x):
    n, h, w, c = x.shape
    return pl.pallas_call(
        _relu_kernel,
        out_shape=jax.ShapeDtypeStruct(x.shape, x.dtype),
        grid=(n,),
        in_specs=[pl.BlockSpec((1, h, w, c), lambda i: (i, 0, 0, 0))],
        out_specs=pl.BlockSpec((1, h, w, c), lambda i: (i, 0, 0, 0)),
        compiler_params=pltpu.CompilerParams(dimension_semantics=("parallel",)),
    )(x)


def _maxpool2_kernel(x_ref, o_ref):
    x = x_ref[0].astype(jnp.float32)
    h, w, c = x.shape
    p = jnp.max(x.reshape(h, w // 2, 2, c), axis=2)
    p = jnp.max(p.reshape(h // 2, 2, w // 2, c), axis=1)
    o_ref[0] = p.astype(o_ref.dtype)


def maxpool2(x):
    n, h, w, c = x.shape
    return pl.pallas_call(
        _maxpool2_kernel,
        out_shape=jax.ShapeDtypeStruct((n, h // 2, w // 2, c), x.dtype),
        grid=(n,),
        in_specs=[pl.BlockSpec((1, h, w, c), lambda i: (i, 0, 0, 0))],
        out_specs=pl.BlockSpec((1, h // 2, w // 2, c), lambda i: (i, 0, 0, 0)),
        compiler_params=pltpu.CompilerParams(dimension_semantics=("parallel",)),
    )(x)


# ----------------------------------------------------------------------------
# VGG19 features[:29] layer list (identical layer indexing to torchvision).
# ----------------------------------------------------------------------------
VGG19_LAYERS = (
    ("conv", 3, 64), ("relu",), ("conv", 64, 64), ("relu",), ("pool",),
    ("conv", 64, 128), ("relu",), ("conv", 128, 128), ("relu",), ("pool",),
    ("conv", 128, 256), ("relu",), ("conv", 256, 256), ("relu",),
    ("conv", 256, 256), ("relu",), ("conv", 256, 256), ("relu",), ("pool",),
    ("conv", 256, 512), ("relu",), ("conv", 512, 512), ("relu",),
    ("conv", 512, 512), ("relu",), ("conv", 512, 512), ("relu",), ("pool",),
    ("conv", 512, 512),                                   # layer index 28
)
assert len(VGG19_LAYERS) == 29


def init_vgg_params(key):
    """Deterministic synthetic conv weights (He init) in kernel layout:
    (9, Cin, Cout) bf16 (tap index t = ky*3+kx) plus f32 bias (Cout,)."""
    params = []
    for spec in VGG19_LAYERS:
        if spec[0] != "conv":
            continue
        cin, cout = spec[1], spec[2]
        key, wk = jax.random.split(key)
        std = (2.0 / (cin * 9)) ** 0.5
        w_torch = std * jax.random.normal(wk, (cout, cin, 3, 3), jnp.float32)
        # (Cout, Cin, ky, kx) -> (ky, kx, Cin, Cout) -> (9, Cin, Cout)
        w = jnp.transpose(w_torch, (2, 3, 1, 0)).reshape(9, cin, cout)
        params.append((w.astype(jnp.bfloat16), jnp.zeros((cout,), jnp.float32)))
    return params


def vgg_forward(x_nchw, params, content_layers, style_layers):
    """Mirrors VGG.forward: returns (content_feats, style_feats) in NCHW f32."""
    content_set, style_set = set(content_layers), set(style_layers)
    capture = content_set | style_set
    n_layers = len(VGG19_LAYERS)
    phys_vmem, vmem_budget = _vmem_limits()

    x = jnp.transpose(x_nchw, (0, 2, 3, 1)).astype(jnp.bfloat16)   # -> NHWC bf16
    content, style = [], []

    def _capture(idx, feat_nhwc):
        f = jnp.transpose(feat_nhwc, (0, 3, 1, 2)).astype(jnp.float32)  # -> NCHW
        if idx in content_set:
            content.append(f)
        if idx in style_set:
            style.append(f)

    i = 0
    conv_i = 0
    while i < n_layers:
        kind = VGG19_LAYERS[i][0]
        if kind == "conv":
            has_relu = i + 1 < n_layers and VGG19_LAYERS[i + 1][0] == "relu"
            has_pool = has_relu and i + 2 < n_layers and VGG19_LAYERS[i + 2][0] == "pool"
            w, b = params[conv_i]
            conv_i += 1
            capture_pre = has_relu and (i in capture)
            capture_mid = has_pool and ((i + 1) in capture)
            cin = w.shape[1]
            if cin == 3 and not has_pool:
                outs = conv_first_block(x, w, b, apply_relu=has_relu,
                                        capture_pre=capture_pre,
                                        phys_vmem=phys_vmem, vmem_budget=vmem_budget)
            else:
                outs = conv_block(x, w, b, apply_relu=has_relu, apply_pool=has_pool,
                                  capture_pre=capture_pre, capture_mid=capture_mid,
                                  phys_vmem=phys_vmem, vmem_budget=vmem_budget)
            main = outs[0]
            k = 1
            if capture_pre:
                _capture(i, outs[k]); k += 1
            elif i in capture:                  # no trailing ReLU: main == conv out
                _capture(i, main)
            if has_relu and (i + 1) in capture:
                if has_pool:
                    _capture(i + 1, outs[k]); k += 1
                else:
                    _capture(i + 1, main)
            if has_pool and (i + 2) in capture:
                _capture(i + 2, main)
            x = main
            i += 1 + int(has_relu) + int(has_pool)
        elif kind == "relu":
            x = relu(x)
            if i in capture:
                _capture(i, x)
            i += 1
        else:
            x = maxpool2(x)
            if i in capture:
                _capture(i, x)
            i += 1
    return content, style


if __name__ == "__main__":
    # Classic Gatys-style layer choices (indices into vgg19.features).
    content_layers = (21,)
    style_layers = (0, 5, 10, 19, 28)

    key = jax.random.PRNGKey(0)
    pkey, xkey = jax.random.split(key)
    params = init_vgg_params(pkey)

    # Small input: batch=2, 3 channels, 32x32 spatial (divisible by the 4 pools).
    x = jax.random.normal(xkey, (2, 3, 32, 32), jnp.float32)

    content, style = vgg_forward(x, params, content_layers, style_layers)
    jax.block_until_ready((content, style))

    # Shape sanity (content: conv4_2 pre-ReLU at 4x4; style pyramid).
    assert content[0].shape == (2, 512, 4, 4)
    assert [s.shape for s in style] == [
        (2, 64, 32, 32), (2, 128, 16, 16), (2, 256, 8, 8),
        (2, 512, 4, 4), (2, 512, 2, 2),
    ]

    # ---- numerical check #1: layer-0 capture vs. pure-JAX f32 reference -----
    w0, b0 = params[0]
    x_nhwc = jnp.transpose(x, (0, 2, 3, 1)).astype(jnp.bfloat16).astype(jnp.float32)
    ref0 = jax.lax.conv_general_dilated(
        x_nhwc, w0.astype(jnp.float32).reshape(3, 3, 3, 64), (1, 1), "SAME",
        dimension_numbers=("NHWC", "HWIO", "NHWC")) + b0
    got0 = jnp.transpose(style[0], (0, 2, 3, 1))
    assert jnp.allclose(got0, ref0, rtol=3e-2, atol=3e-2)

    # ---- numerical check #2: strip conv (4 strips -> exercises halo DMAs,
    #      fused ReLU + pool + pre-ReLU capture) vs. pure-JAX reference --------
    phys, budget = _vmem_limits()
    tk1, tk2, tk3 = jax.random.split(jax.random.PRNGKey(1), 3)
    xt = jax.random.normal(tk1, (1, 16, 16, 64), jnp.float32).astype(jnp.bfloat16)
    wt = (0.05 * jax.random.normal(tk2, (9, 64, 128), jnp.float32)).astype(jnp.bfloat16)
    bt = 0.1 * jax.random.normal(tk3, (128,), jnp.float32)
    main_t, pre_t = conv_block(xt, wt, bt, apply_relu=True, apply_pool=True,
                               capture_pre=True, capture_mid=False,
                               phys_vmem=phys, vmem_budget=budget, strip=4)
    ref_pre = jax.lax.conv_general_dilated(
        xt.astype(jnp.float32), wt.astype(jnp.float32).reshape(3, 3, 64, 128),
        (1, 1), "SAME", dimension_numbers=("NHWC", "HWIO", "NHWC")) + bt
    ref_act = jnp.maximum(ref_pre, 0.0)
    ref_pool = jax.lax.reduce_window(ref_act, -jnp.inf, jax.lax.max,
                                     (1, 2, 2, 1), (1, 2, 2, 1), "VALID")
    assert jnp.allclose(pre_t.astype(jnp.float32), ref_pre, rtol=3e-2, atol=3e-2)
    assert jnp.allclose(main_t.astype(jnp.float32), ref_pool, rtol=3e-2, atol=3e-2)

    print("KERNEL_OK")
</pallas_src>

<mosaic_0001>
module attributes {stable_mosaic.version = 11 : i64} {
  func.func @kernel(%arg0: i32, %arg1: i32, %arg2: memref<1x32x32x27xbf16, #tpu.memory_space<vmem>>, %arg3: memref<27x64xbf16, #tpu.memory_space<vmem>>, %arg4: memref<1x64xf32, #tpu.memory_space<vmem>>, %arg5: memref<1x32x32x64xbf16, #tpu.memory_space<vmem>>, %arg6: memref<1x32x32x64xbf16, #tpu.memory_space<vmem>>) attributes {dimension_semantics = [#tpu.dimension_semantics<parallel>, #tpu.dimension_semantics<parallel>], iteration_bounds = array<i64: 2, 1>, scalar_prefetch = 0 : i64, scratch_operands = 0 : i64, tpu.core_type = #tpu.core_type<tc>, window_params = [{transform_indices = @transform_0, window_bounds = array<i64: 1, 32, 32, 27>}, {pipeline_mode = #tpu.pipeline_mode<synchronous>, transform_indices = @transform_1, window_bounds = array<i64: 27, 64>}, {pipeline_mode = #tpu.pipeline_mode<synchronous>, transform_indices = @transform_2, window_bounds = array<i64: 1, 64>}, {transform_indices = @transform_3, window_bounds = array<i64: 1, 32, 32, 64>}, {transform_indices = @transform_4, window_bounds = array<i64: 1, 32, 32, 64>}]} {
    %c0 = arith.constant 0 : index
    %c0_0 = arith.constant 0 : index
    %c0_1 = arith.constant 0 : index
    %c0_2 = arith.constant 0 : index
    %0 = vector.load %arg2[%c0, %c0_0, %c0_1, %c0_2] : memref<1x32x32x27xbf16, #tpu.memory_space<vmem>>, vector<1x32x32x27xbf16>
    %1 = vector.shape_cast %0 : vector<1x32x32x27xbf16> to vector<32x32x27xbf16>
    %2 = vector.shape_cast %1 : vector<32x32x27xbf16> to vector<1024x27xbf16>
    %c0_3 = arith.constant 0 : index
    %c0_4 = arith.constant 0 : index
    %3 = vector.load %arg3[%c0_3, %c0_4] : memref<27x64xbf16, #tpu.memory_space<vmem>>, vector<27x64xbf16>
    %cst = arith.constant dense<0.000000e+00> : vector<1024x64xf32>
    %4 = tpu.matmul %2, %3, %cst {dimension_numbers = #tpu.dot_dimension_numbers<[1], [0], [0], [1], [0, 0, 1, 1], [], []>} : vector<1024x27xbf16>, vector<27x64xbf16>, vector<1024x64xf32> -> vector<1024x64xf32>
    %c0_5 = arith.constant 0 : index
    %c0_6 = arith.constant 0 : index
    %5 = vector.load %arg4[%c0_5, %c0_6] : memref<1x64xf32, #tpu.memory_space<vmem>>, vector<1x64xf32>
    %6 = vector.broadcast %5 : vector<1x64xf32> to vector<1024x64xf32>
    %7 = arith.addf %4, %6 : vector<1024x64xf32>
    %8 = vector.shape_cast %7 : vector<1024x64xf32> to vector<32x32x64xf32>
    %9 = arith.truncf %8 : vector<32x32x64xf32> to vector<32x32x64xbf16>
    %c0_7 = arith.constant 0 : index
    %c0_8 = arith.constant 0 : index
    %c0_9 = arith.constant 0 : index
    %c0_10 = arith.constant 0 : index
    %10 = vector.load %arg6[%c0_7, %c0_8, %c0_9, %c0_10] : memref<1x32x32x64xbf16, #tpu.memory_space<vmem>>, vector<1x32x32x64xbf16>
    %11 = vector.shape_cast %10 : vector<1x32x32x64xbf16> to vector<32x32x64xbf16>
    %12 = vector.shape_cast %9 : vector<32x32x64xbf16> to vector<1x32x32x64xbf16>
    tpu.vector_store %arg6[%c0_7, %c0_8, %c0_9, %c0_10], %12 {strides = array<i32>} : memref<1x32x32x64xbf16, #tpu.memory_space<vmem>>, vector<1x32x32x64xbf16>,
    %cst_11 = arith.constant 0.000000e+00 : f32
    %13 = vector.broadcast %cst_11 : f32 to vector<32x32x64xf32>
    %14 = arith.maximumf %8, %13 : vector<32x32x64xf32>
    %15 = arith.truncf %14 : vector<32x32x64xf32> to vector<32x32x64xbf16>
    %c0_12 = arith.constant 0 : index
    %c0_13 = arith.constant 0 : index
    %c0_14 = arith.constant 0 : index
    %c0_15 = arith.constant 0 : index
    %16 = vector.load %arg5[%c0_12, %c0_13, %c0_14, %c0_15] : memref<1x32x32x64xbf16, #tpu.memory_space<vmem>>, vector<1x32x32x64xbf16>
    %17 = vector.shape_cast %16 : vector<1x32x32x64xbf16> to vector<32x32x64xbf16>
    %18 = vector.shape_cast %15 : vector<32x32x64xbf16> to vector<1x32x32x64xbf16>
    tpu.vector_store %arg5[%c0_12, %c0_13, %c0_14, %c0_15], %18 {strides = array<i32>} : memref<1x32x32x64xbf16, #tpu.memory_space<vmem>>, vector<1x32x32x64xbf16>,
    return
  }
  func.func @transform_0(%arg0: i32, %arg1: i32) -> (i32, i32, i32, i32) {
    %c0_i32 = arith.constant 0 : i32
    %c0_i32_0 = arith.constant 0 : i32
    %c0_i32_1 = arith.constant 0 : i32
    return %arg0, %arg1, %c0_i32, %c0_i32_0 : i32, i32, i32, i32
  }
  func.func @transform_1(%arg0: i32, %arg1: i32) -> (i32, i32) {
    %c0_i32 = arith.constant 0 : i32
    %c0_i32_0 = arith.constant 0 : i32
    %c0_i32_1 = arith.constant 0 : i32
    return %c0_i32, %c0_i32_0 : i32, i32
  }
  func.func @transform_2(%arg0: i32, %arg1: i32) -> (i32, i32) {
    %c0_i32 = arith.constant 0 : i32
    %c0_i32_0 = arith.constant 0 : i32
    %c0_i32_1 = arith.constant 0 : i32
    return %c0_i32, %c0_i32_0 : i32, i32
  }
  func.func @transform_3(%arg0: i32, %arg1: i32) -> (i32, i32, i32, i32) {
    %c0_i32 = arith.constant 0 : i32
    %c0_i32_0 = arith.constant 0 : i32
    %c0_i32_1 = arith.constant 0 : i32
    return %arg0, %arg1, %c0_i32, %c0_i32_0 : i32, i32, i32, i32
  }
  func.func @transform_4(%arg0: i32, %arg1: i32) -> (i32, i32, i32, i32) {
    %c0_i32 = arith.constant 0 : i32
    %c0_i32_0 = arith.constant 0 : i32
    %c0_i32_1 = arith.constant 0 : i32
    return %arg0, %arg1, %c0_i32, %c0_i32_0 : i32, i32, i32, i32
  }
}

</mosaic_0001>

<bundles_post_ra>
// kernel: tpu_custom_call.1
= control target key start
LH: loop header
LB: loop body
LE: loop exit
PB: predicated region body
PF: predicated region fallthrough
CT: control target
= control target key end

     0   :  { %10 = vsyncpa [#allocation3], 0  ;;  %s5119_s0 = inlined_call_operand.vmem [shape: bf16[2,32,32,27], index: 0, kind: input, shape index: {}]   ;;  %s5120_s1 = inlined_call_operand.vmem [shape: bf16[27,64], index: 1, kind: input, shape index: {}]   ;;  %s5121_s2 = inlined_call_operand.vmem [shape: f32[1,64], index: 2, kind: input, shape index: {}]   ;;  %s5122_s3 = inlined_call_operand.hbm [shape: bf16[2,32,32,64], index: 3, kind: output, shape index: {0}]   ;;  %s5123_s4 = inlined_call_operand.hbm [shape: bf16[2,32,32,64], index: 4, kind: output, shape index: {1}]  }
   0x1   :  { %12 = vsyncpa [#allocation3 + $0x1], 0 }
   0x2   :  { %13 = vsyncpa [#allocation5], 0 }
   0x3   :  { %15 = vsyncpa [#allocation5 + $0x1], 0  ;;  %s4164_s15 = smov 0   ;;  %s4166_s16 = smov 0  }
   0x4   :  { %s4168_s17 = smov 0   ;;  %s4170_s18 = smov 0  }
   0x5   :  { %s4172_s19 = smov 0   ;;  %s4174_s20 = smov 0  }
   0x6 LB: > { %s3027_s21 = sadd.s32 4294967295, %s4132_s20   ;;  %s3028_s22 = sadd.s32 4294967294, %s4132_s20   ;;  %s4132_s20 = sphi %s4174_s20, %s21_s20   ;;  %s4128_s19 = sphi %s4172_s19, %s5130_s19   ;;  %s4124_s18 = sphi %s4170_s18, %s5129_s18   ;;  %s4120_s17 = sphi %s4168_s17, %s5128_s17   ;;  %s4116_s16 = sphi %s4166_s16, %s5127_s16   ;;  %s4112_s15 = sphi %s4164_s15, %s5126_s15  }
   0x7   : > { %s33_s23 = sadd.s32 1, %s4128_s19  ;;  %s112_s24 = sadd.s32 1, %s4120_s17 }
   0x8   : > { %p35_p0 = scmp.ge.s32.totalorder %s33_s23, 2  ;;  %p122_p1 = scmp.ne.s32.totalorder %s4120_s17, %s4116_s16 }
   0x9   : > { %p123_p2 = scmp.eq.s32.totalorder %s3027_s21, 1  ;;  %p128_p3 = scmp.ne.s32.totalorder %s4116_s16, %s4112_s15 }
   0xa   : > { %s5132_s23 = smov (%p35_p0, %s33_s23), 0  ;;  %p129_p5 = scmp.eq.s32.totalorder %s3028_s22, 1 }
   0xb   : > { %p4204_p4 = por %p123_p2, %p122_p1  ;;  %s107_s26 = ssub.s32 %s4128_s19, %s5132_s23 }
   0xc   : > { %p3031_p6 = scmp.ge.s32.totalorder %s4132_s20, 1  ;;  %p110_p7 = scmp.eq.s32.totalorder %s107_s26, 0 }
   0xd   : > { %p4211_p8 = por %p129_p5, %p128_p3  ;;  %p195_p9 = scmp.lt.s32.totalorder %s4132_s20, 3 }
   0xe   : > { %s4217_s28 = scalar_select %p110_p7, %s4120_s17, %s112_s24  }
   0xf   : > { %p196_p10 = pnand %p3031_p6, %p195_p9 }
  0x10   : > { %v3955_v0 = vld [vmem:[%s5120_s1] sm:$0xff] (!%p196_p10)   ;;  %vm908_vm0 = vcmask (!%p196_p10), 1044480   ;;  %v3956_v1 = vld [vmem:[%s5120_s1 + $0x8] sm:$0x3f] (!%p196_p10)   ;;  %vm909_vm1 = vcmask (!%p196_p10), 1045504   ;;  %p232_p11 = scmp.lt.s32.totalorder (!%p196_p10), %s4124_s18, 1 }
  0x11   : > { %199 = sbr.rel (%p196_p10) target bundleno = 418 (0x1a2), region = 32  ;;  %3756 = vmatprep.subr.bf16.mxu0 (!%p196_p10), %v3955_v0  ;;  %3888 = vmatprep.subr.bf16.mxu1 (!%p196_p10), %v3955_v0  ;;  %v4134_v2 = vmov (!%p196_p10), 65535   ;;  %vm715_vm2 = vcmask (!%p196_p10), 220160   ;;  %s4361_s12 = sand.u32 (!%p196_p10), 1, %s4116_s16   ;;  %vm1972_vm3 = vcmask (!%p196_p10), 519168  }
  0x12   : > { %3757 = vmatpush3.bf16.msra.mxu0 (!%p196_p10), %v3955_v0  ;;  %3890 = vmatpush3.bf16.msra.mxu1 (!%p196_p10), %v3955_v0  ;;  %v910_v3 = vsel (!%p196_p10), %vm908_vm0, 4294967295, %v4134_v2  ;;  %s3032_s21 = sshll.u32 (!%p196_p10), %s4361_s12, 9  ;;  %s3688_s30 = sshll.u32 (!%p196_p10), %s4124_s18, 13 }
  0x13   : > { %v911_v4 = vsel (!%p196_p10), %vm909_vm1, %v910_v3, 0  ;;  %s4376_s22 = scalar_lea.vmem (!%p196_p10), [#allocation4], %s3032_s21  ;;  %s4387_s24 = scalar_lea.vmem (!%p196_p10), [#allocation2], %s3032_s21 }
  0x14   : > { %v913_v5 = vand.u32 (!%p196_p10), %v3956_v1, %v911_v4  ;;  %s2910_s5 = sshll.u32 (!%p196_p10), %s4376_s22, 4  ;;  %s2891_s6 = sshll.u32 (!%p196_p10), %s4387_s24, 4  ;;  %s5014_s5 = int_to_ptr.vmem [resolvable:$true] %s2910_s5  ;;  %s5033_s6 = int_to_ptr.vmem [resolvable:$true] %s2891_s6 }
  0x15   : > { %s5012_s9 = scalar_lea.hbm (!%p196_p10), %s5123_s4, %s3688_s30  ;;  %s5031_s13 = scalar_lea.hbm (!%p196_p10), %s5122_s3, %s3688_s30 }
  0x16   : > { %3758 = vmatprep.subr.bf16.mxu0 (!%p196_p10), %v913_v5  ;;  %3889 = vmatprep.subr.bf16.mxu1 (!%p196_p10), %v913_v5  ;;  %s2875_s14 = scalar_lea.sflag (!%p196_p10), [#allocation5], %s4361_s12  ;;  %s4022_s21 = scalar_lea.vmem (!%p196_p10), %s5014_s5, 8192 }
  0x17   : > { %3759 = vmatpush3.bf16.msra.mxu0 (!%p196_p10), %v913_v5  ;;  %3891 = vmatpush3.bf16.msra.mxu1 (!%p196_p10), %v913_v5  ;;  %p4023_p12 = scmp.ne.s32.totalorder (!%p196_p10), %s5014_s5, %s4022_s21  ;;  %s4135_s26 = smov (!%p196_p10), [#allocation4]  }
  0x18   : > { %s233_s7 = scalar_select %p232_p11, %s4124_s18, 1 }
  0x19   : > { %p4024_p13 = pnand %p4023_p12, %p4204_p4  ;;  %s4026_s29 = sshll.u32 %s4135_s26, 4  ;;  %s4027_s29 = int_to_ptr.vmem [resolvable:$false] %s4026_s29 }
  0x1a   : > { %s3431_s8 = sshll.u32 %s233_s7, 9  ;;  %s4028_s18 = scalar_lea.vmem %s4027_s29, 16384 }
  0x1b   : > { %s4230_s11 = scalar_lea.vmem %s5119_s0, %s3431_s8  ;;  %p4025_p0 = pneg %p4024_p13 }
  0x1c   : > { %v3957_v6 = vld [vmem:[%s4230_s11] sm:$0xff]   ;;  %v3959_v8 = vld [vmem:[%s4230_s11 + $0x8] sm:$0xff]   ;;  %v3961_v10 = vld [vmem:[%s4230_s11 + $0x10] sm:$0xff]   ;;  %p4029_p1 = scmp.lt.s32.totalorder %s5014_s5, %s4027_s29  ;;  %p4030_p2 = scmp.lt.s32.totalorder %s4028_s18, %s4022_s21 }
  0x1d   : > { %v3958_v7 = vld [vmem:[%s4230_s11 + $0x100] sm:$0xff]   ;;  %3760 = vmatprep.mubr.msk.bf16.mxu0 %vm715_vm2, %v3957_v6  ;;  %v3960_v9 = vld [vmem:[%s4230_s11 + $0x108] sm:$0xff]   ;;  %v3962_v11 = vld [vmem:[%s4230_s11 + $0x110] sm:$0xff]  }
  0x1e   : > { %3824 = vmatprep.mubr.msk.bf16.mxu1 %vm715_vm2, %v3958_v7  ;;  %3761 = vmatmul.mubr.msk.bf16.vlgmr.msra.gmra.mrb[0].mxu0 %vm715_vm2, %v3959_v8  ;;  %v3963_v12 = vld [vmem:[%s4230_s11 + $0x18] sm:$0xff]   ;;  %v3965_v14 = vld [vmem:[%s4230_s11 + $0x20] sm:$0xff]   ;;  %v3967_v16 = vld [vmem:[%s4230_s11 + $0x28] sm:$0xff]   ;;  %p4031_p3 = por %p4030_p2, %p4029_p1 }
  0x1f   : > { %3825 = vmatmul.mubr.msk.bf16.vlgmr.msra.gmra.mrb[0].mxu1 %vm715_vm2, %v3960_v9  ;;  %3764 = vmatprep.mubr.msk.bf16.mxu0 %vm715_vm2, %v3961_v10  ;;  %v3964_v13 = vld [vmem:[%s4230_s11 + $0x118] sm:$0xff]   ;;  %v3966_v15 = vld [vmem:[%s4230_s11 + $0x120] sm:$0xff]   ;;  %v3968_v17 = vld [vmem:[%s4230_s11 + $0x128] sm:$0xff]  }
  0x20   : > { %3828 = vmatprep.mubr.msk.bf16.mxu1 %vm715_vm2, %v3962_v11  ;;  %v3969_v18 = vld [vmem:[%s4230_s11 + $0x30] sm:$0xff]   ;;  %v3971_v20 = vld [vmem:[%s4230_s11 + $0x38] sm:$0xff]   ;;  %v3973_v22 = vld [vmem:[%s4230_s11 + $0x40] sm:$0xff]   ;;  %p4032_p5 = pnand %p4031_p3, %p4025_p0 }
  0x21   : > { %v3970_v19 = vld [vmem:[%s4230_s11 + $0x130] sm:$0xff]   ;;  %v3972_v21 = vld [vmem:[%s4230_s11 + $0x138] sm:$0xff]   ;;  %v3974_v23 = vld [vmem:[%s4230_s11 + $0x140] sm:$0xff]  }
  0x22   : > { %v3975_v24 = vld [vmem:[%s4230_s11 + $0x48] sm:$0xff]   ;;  %v3977_v26 = vld [vmem:[%s4230_s11 + $0x50] sm:$0xff]   ;;  %v3979_v28 = vld [vmem:[%s4230_s11 + $0x58] sm:$0xff]  }
  0x23   : > { %v3976_v25 = vld [vmem:[%s4230_s11 + $0x148] sm:$0xff]   ;;  %v3978_v27 = vld [vmem:[%s4230_s11 + $0x150] sm:$0xff]   ;;  %v3980_v29 = vld [vmem:[%s4230_s11 + $0x158] sm:$0xff]  }
  0x24   : > { %v3981_v30 = vld [vmem:[%s4230_s11 + $0x60] sm:$0xff]   ;;  %v3983_v32 = vld [vmem:[%s4230_s11 + $0x68] sm:$0xff]   ;;  %v3985_v34 = vld [vmem:[%s4230_s11 + $0x70] sm:$0xff]  }
  0x25   : > { %v3982_v31 = vld [vmem:[%s4230_s11 + $0x160] sm:$0xff]   ;;  %v3984_v33 = vld [vmem:[%s4230_s11 + $0x168] sm:$0xff]   ;;  %v3986_v35 = vld [vmem:[%s4230_s11 + $0x170] sm:$0xff]  }
  0x26   : > { %3765 = vmatmul.mubr.msk.bf16.gmra.mrb[4].mxu0 %vm715_vm2, %v3963_v12  ;;  %v3987_v36 = vld [vmem:[%s4230_s11 + $0x78] sm:$0xff]   ;;  %v3989_v38 = vld [vmem:[%s4230_s11 + $0x80] sm:$0xff]   ;;  %v3991_v40 = vld [vmem:[%s4230_s11 + $0x88] sm:$0xff]  }
  0x27   : > { %3829 = vmatmul.mubr.msk.bf16.gmra.mrb[4].mxu1 %vm715_vm2, %v3964_v13  ;;  %3768 = vmatprep.mubr.msk.bf16.mxu0 %vm715_vm2, %v3965_v14  ;;  %v3988_v37 = vld [vmem:[%s4230_s11 + $0x178] sm:$0xff]   ;;  %v3990_v39 = vld [vmem:[%s4230_s11 + $0x180] sm:$0xff]   ;;  %v3992_v41 = vld [vmem:[%s4230_s11 + $0x188] sm:$0xff]  }
  0x28   : > { %3832 = vmatprep.mubr.msk.bf16.mxu1 %vm715_vm2, %v3966_v15  ;;  %v3993_v42 = vld [vmem:[%s4230_s11 + $0x90] sm:$0xff]   ;;  %v3995_v44 = vld [vmem:[%s4230_s11 + $0x98] sm:$0xff]   ;;  %v3997_v46 = vld [vmem:[%s4230_s11 + $0xa0] sm:$0xff]  }
  0x29   : > { %v3994_v43 = vld [vmem:[%s4230_s11 + $0x190] sm:$0xff]   ;;  %v3996_v45 = vld [vmem:[%s4230_s11 + $0x198] sm:$0xff]   ;;  %v3998_v47 = vld [vmem:[%s4230_s11 + $0x1a0] sm:$0xff]  }
  0x2a   : > { %v3999_v48 = vld [vmem:[%s4230_s11 + $0xa8] sm:$0xff]   ;;  %v4001_v50 = vld [vmem:[%s4230_s11 + $0xb0] sm:$0xff]   ;;  %v4003_v52 = vld [vmem:[%s4230_s11 + $0xb8] sm:$0xff]  }
  0x2b   : > { %v4000_v49 = vld [vmem:[%s4230_s11 + $0x1a8] sm:$0xff]   ;;  %v4002_v51 = vld [vmem:[%s4230_s11 + $0x1b0] sm:$0xff]   ;;  %v4004_v53 = vld [vmem:[%s4230_s11 + $0x1b8] sm:$0xff]  }
  0x2c   : > { %v4005_v54 = vld [vmem:[%s4230_s11 + $0xc0] sm:$0xff]   ;;  %v4007_v56 = vld [vmem:[%s4230_s11 + $0xc8] sm:$0xff]   ;;  %v4009_v58 = vld [vmem:[%s4230_s11 + $0xd0] sm:$0xff]  }
  0x2d   : > { %v4006_v55 = vld [vmem:[%s4230_s11 + $0x1c0] sm:$0xff]   ;;  %v4008_v57 = vld [vmem:[%s4230_s11 + $0x1c8] sm:$0xff]   ;;  %v4010_v59 = vld [vmem:[%s4230_s11 + $0x1d0] sm:$0xff]  }
  0x2e   : > { %3769 = vmatmul.mubr.msk.bf16.gmra.mrb[8].mxu0 %vm715_vm2, %v3967_v16  ;;  %v4011_v60 = vld [vmem:[%s4230_s11 + $0xd8] sm:$0xff]   ;;  %v4013_v62 = vld [vmem:[%s4230_s11 + $0xe0] sm:$0xff]   ;;  %v4015_v0 = vld [vmem:[%s4230_s11 + $0xe8] sm:$0xff]  }
  0x2f   : > { %3833 = vmatmul.mubr.msk.bf16.gmra.mrb[8].mxu1 %vm715_vm2, %v3968_v17  ;;  %3772 = vmatprep.mubr.msk.bf16.mxu0 %vm715_vm2, %v3969_v18  ;;  %v4012_v61 = vld [vmem:[%s4230_s11 + $0x1d8] sm:$0xff]   ;;  %v4014_v63 = vld [vmem:[%s4230_s11 + $0x1e0] sm:$0xff]   ;;  %v4016_v1 = vld [vmem:[%s4230_s11 + $0x1e8] sm:$0xff]  }
  0x30   : > { %3836 = vmatprep.mubr.msk.bf16.mxu1 %vm715_vm2, %v3970_v19  ;;  %v4017_v2 = vld [vmem:[%s4230_s11 + $0xf0] sm:$0xff]   ;;  %v4019_v4 = vld [vmem:[%s4230_s11 + $0xf8] sm:$0xff]   ;;  %v4366_v6 = vld [vmem:[%s5121_s2] ss:$0 sm:$0xff] }
  0x31   : > { %v4018_v3 = vld [vmem:[%s4230_s11 + $0x1f0] sm:$0xff]   ;;  %v4020_v5 = vld [vmem:[%s4230_s11 + $0x1f8] sm:$0xff]  }
  0x36   : > { %3773 = vmatmul.mubr.msk.bf16.gmra.mrb[12].mxu0 %vm715_vm2, %v3971_v20 }
  0x37   : > { %3837 = vmatmul.mubr.msk.bf16.gmra.mrb[12].mxu1 %vm715_vm2, %v3972_v21  ;;  %3776 = vmatprep.mubr.msk.bf16.mxu0 %vm715_vm2, %v3973_v22 }
  0x38   : > { %3840 = vmatprep.mubr.msk.bf16.mxu1 %vm715_vm2, %v3974_v23 }
  0x3e   : > { %3777 = vmatmul.mubr.msk.bf16.gmra.mrb[16].mxu0 %vm715_vm2, %v3975_v24 }
  0x3f   : > { %3841 = vmatmul.mubr.msk.bf16.gmra.mrb[16].mxu1 %vm715_vm2, %v3976_v25  ;;  %3780 = vmatprep.mubr.msk.bf16.mxu0 %vm715_vm2, %v3977_v26 }
  0x40   : > { %3844 = vmatprep.mubr.msk.bf16.mxu1 %vm715_vm2, %v3978_v27 }
  0x46   : > { %3781 = vmatmul.mubr.msk.bf16.gmra.mrb[20].mxu0 %vm715_vm2, %v3979_v28 }
  0x47   : > { %3845 = vmatmul.mubr.msk.bf16.gmra.mrb[20].mxu1 %vm715_vm2, %v3980_v29  ;;  %3784 = vmatprep.mubr.msk.bf16.mxu0 %vm715_vm2, %v3981_v30 }
  0x48   : > { %3848 = vmatprep.mubr.msk.bf16.mxu1 %vm715_vm2, %v3982_v31 }
  0x4e   : > { %3785 = vmatmul.mubr.msk.bf16.gmra.mrb[24].mxu0 %vm715_vm2, %v3983_v32 }
  0x4f   : > { %3849 = vmatmul.mubr.msk.bf16.gmra.mrb[24].mxu1 %vm715_vm2, %v3984_v33  ;;  %3788 = vmatprep.mubr.msk.bf16.mxu0 %vm715_vm2, %v3985_v34 }
  0x50   : > { %3852 = vmatprep.mubr.msk.bf16.mxu1 %vm715_vm2, %v3986_v35 }
  0x56   : > { %3789 = vmatmul.mubr.msk.bf16.gmra.mrb[28].mxu0 %vm715_vm2, %v3987_v36 }
  0x57   : > { %3853 = vmatmul.mubr.msk.bf16.gmra.mrb[28].mxu1 %vm715_vm2, %v3988_v37  ;;  %3792 = vmatprep.mubr.msk.bf16.mxu0 %vm715_vm2, %v3989_v38 }
  0x58   : > { %3856 = vmatprep.mubr.msk.bf16.mxu1 %vm715_vm2, %v3990_v39 }
  0x5e   : > { %3793 = vmatmul.mubr.msk.bf16.gmra.mrb[32].mxu0 %vm715_vm2, %v3991_v40 }
  0x5f   : > { %3857 = vmatmul.mubr.msk.bf16.gmra.mrb[32].mxu1 %vm715_vm2, %v3992_v41  ;;  %3796 = vmatprep.mubr.msk.bf16.mxu0 %vm715_vm2, %v3993_v42 }
  0x60   : > { %3860 = vmatprep.mubr.msk.bf16.mxu1 %vm715_vm2, %v3994_v43 }
  0x66   : > { %3797 = vmatmul.mubr.msk.bf16.gmra.mrb[36].mxu0 %vm715_vm2, %v3995_v44 }
  0x67   : > { %3861 = vmatmul.mubr.msk.bf16.gmra.mrb[36].mxu1 %vm715_vm2, %v3996_v45  ;;  %3800 = vmatprep.mubr.msk.bf16.mxu0 %vm715_vm2, %v3997_v46 }
  0x68   : > { %3864 = vmatprep.mubr.msk.bf16.mxu1 %vm715_vm2, %v3998_v47 }
  0x6e   : > { %3801 = vmatmul.mubr.msk.bf16.gmra.mrb[40].mxu0 %vm715_vm2, %v3999_v48 }
  0x6f   : > { %3865 = vmatmul.mubr.msk.bf16.gmra.mrb[40].mxu1 %vm715_vm2, %v4000_v49  ;;  %3804 = vmatprep.mubr.msk.bf16.mxu0 %vm715_vm2, %v4001_v50 }
  0x70   : > { %3868 = vmatprep.mubr.msk.bf16.mxu1 %vm715_vm2, %v4002_v51 }
  0x76   : > { %3805 = vmatmul.mubr.msk.bf16.gmra.mrb[44].mxu0 %vm715_vm2, %v4003_v52 }
  0x77   : > { %3869 = vmatmul.mubr.msk.bf16.gmra.mrb[44].mxu1 %vm715_vm2, %v4004_v53  ;;  %3808 = vmatprep.mubr.msk.bf16.mxu0 %vm715_vm2, %v4005_v54 }
  0x78   : > { %3872 = vmatprep.mubr.msk.bf16.mxu1 %vm715_vm2, %v4006_v55 }
  0x7e   : > { %3809 = vmatmul.mubr.msk.bf16.gmra.mrb[48].mxu0 %vm715_vm2, %v4007_v56 }
  0x7f   : > { %3873 = vmatmul.mubr.msk.bf16.gmra.mrb[48].mxu1 %vm715_vm2, %v4008_v57  ;;  %3812 = vmatprep.mubr.msk.bf16.mxu0 %vm715_vm2, %v4009_v58 }
  0x80   : > { %3876 = vmatprep.mubr.msk.bf16.mxu1 %vm715_vm2, %v4010_v59 }
  0x86   : > { %3813 = vmatmul.mubr.msk.bf16.gmra.mrb[52].mxu0 %vm715_vm2, %v4011_v60 }
  0x87   : > { %3877 = vmatmul.mubr.msk.bf16.gmra.mrb[52].mxu1 %vm715_vm2, %v4012_v61  ;;  %3816 = vmatprep.mubr.msk.bf16.mxu0 %vm715_vm2, %v4013_v62 }
  0x88   : > { %3880 = vmatprep.mubr.msk.bf16.mxu1 %vm715_vm2, %v4014_v63 }
  0x8e   : > { %3817 = vmatmul.mubr.msk.bf16.gmra.mrb[56].mxu0 %vm715_vm2, %v4015_v0 }
  0x8f   : > { %3881 = vmatmul.mubr.msk.bf16.gmra.mrb[56].mxu1 %vm715_vm2, %v4016_v1  ;;  %3820 = vmatprep.mubr.msk.bf16.mxu0 %vm715_vm2, %v4017_v2 }
  0x90   : > { %3884 = vmatprep.mubr.msk.bf16.mxu1 %vm715_vm2, %v4018_v3 }
  0x96   : > { %3821 = vmatmul.mubr.msk.bf16.gmra.mrb[60].mxu0 %vm715_vm2, %v4019_v4 }
  0x97   : > { %3885 = vmatmul.mubr.msk.bf16.gmra.mrb[60].mxu1 %vm715_vm2, %v4020_v5 }
  0xf1   : > { %v3762_v7 = vpop.f32.mrb[0].mxu0 }
  0xf2   : > { %v958_v8 = vadd.f32 %v3762_v7, %v4366_v6  ;;  %v3826_v9 = vpop.f32.mrb[0].mxu1  ;;  %v949_v10 = vpop.f32.mrb[1].mxu0 }
  0xf3   : > { %v1214_v11 = vadd.f32 %v3826_v9, %v4366_v6  ;;  %v950_v12 = vadd.f32 %v4366_v6, %v949_v10  ;;  %v1205_v13 = vpop.f32.mrb[1].mxu1  ;;  %v3763_v14 = vpop.f32.mrb[2].mxu0 }
  0xf4   : > { %v3434_v15 = vpack.c.bf16 %v958_v8, %v958_v8  ;;  %v2103_v16 = vmax.f32 %v958_v8, 0.0  ;;  %v1206_v17 = vadd.f32 %v4366_v6, %v1205_v13  ;;  %v961_v18 = vadd.f32 %v3763_v14, %v4366_v6  ;;  %v3827_v19 = vpop.f32.mrb[2].mxu1  ;;  %v952_v20 = vpop.f32.mrb[3].mxu0 }
  0xf5   : > { %v3498_v21 = vpack.c.bf16 %v1214_v11, %v1214_v11  ;;  %v2167_v22 = vmax.f32 %v1214_v11, 0.0  ;;  %v3432_v23 = vpack.c.bf16 %v950_v12, %v950_v12  ;;  %v2101_v24 = vmax.f32 %v950_v12, 0.0  ;;  %v1208_v25 = vpop.f32.mrb[3].mxu1 }
  0xf6   : > { %1975 = vst.msk [vmem:[%s4376_s22 + $0x8] sm:$0xf] %vm1972_vm3, %v3434_v15  ;;  %v3562_v26 = vpack.c.bf16 %v2103_v16, %v2103_v16  ;;  %v3496_v27 = vpack.c.bf16 %v1206_v17, %v1206_v17  ;;  %v2165_v28 = vmax.f32 %v1206_v17, 0.0  ;;  %v3435_v29 = vpack.c.bf16 %v961_v18, %v961_v18 }
  0xf7   : > { %2039 = vst.msk [vmem:[%s4376_s22 + $0x108] sm:$0xf] %vm1972_vm3, %v3498_v21  ;;  %v3626_v30 = vpack.c.bf16 %v2167_v22, %v2167_v22  ;;  %1973 = vst.msk [vmem:[%s4376_s22] sm:$0xf] %vm1972_vm3, %v3432_v23  ;;  %v3560_v31 = vpack.c.bf16 %v2101_v24, %v2101_v24  ;;  %v2104_v32 = vmax.f32 %v961_v18, 0.0  ;;  %v1217_v33 = vadd.f32 %v3827_v19, %v4366_v6 }
  0xf8   : > { %2743 = vst.msk [vmem:[%s4387_s24 + $0x8] sm:$0xf] %vm1972_vm3, %v3562_v26  ;;  %2037 = vst.msk [vmem:[%s4376_s22 + $0x100] sm:$0xf] %vm1972_vm3, %v3496_v27  ;;  %v3624_v34 = vpack.c.bf16 %v2165_v28, %v2165_v28  ;;  %v953_v35 = vadd.f32 %v4366_v6, %v952_v20  ;;  %v1209_v36 = vadd.f32 %v4366_v6, %v1208_v25 }
  0xf9   : > { %1976 = vst.msk [vmem:[%s4376_s22 + $0xc] sm:$0xf] %vm1972_vm3, %v3435_v29  ;;  %2807 = vst.msk [vmem:[%s4387_s24 + $0x108] sm:$0xf] %vm1972_vm3, %v3626_v30  ;;  %v3563_v37 = vpack.c.bf16 %v2104_v32, %v2104_v32  ;;  %v3499_v38 = vpack.c.bf16 %v1217_v33, %v1217_v33  ;;  %v2168_v39 = vmax.f32 %v1217_v33, 0.0  ;;  %v3766_v40 = vpop.f32.mrb[4].mxu0 }
  0xfa   : > { %2741 = vst.msk [vmem:[%s4387_s24] sm:$0xf] %vm1972_vm3, %v3560_v31  ;;  %2805 = vst.msk [vmem:[%s4387_s24 + $0x100] sm:$0xf] %vm1972_vm3, %v3624_v34  ;;  %v3433_v41 = vpack.c.bf16 %v953_v35, %v953_v35  ;;  %v2102_v42 = vmax.f32 %v953_v35, 0.0  ;;  %v3497_v43 = vpack.c.bf16 %v1209_v36, %v1209_v36  ;;  %v2166_v44 = vmax.f32 %v1209_v36, 0.0 }
  0xfb   : > { %v3830_v45 = vpop.f32.mrb[4].mxu1  ;;  %v965_v46 = vpop.f32.mrb[5].mxu0  ;;  %2744 = vst.msk [vmem:[%s4387_s24 + $0xc] sm:$0xf] %vm1972_vm3, %v3563_v37  ;;  %2040 = vst.msk [vmem:[%s4376_s22 + $0x10c] sm:$0xf] %vm1972_vm3, %v3499_v38  ;;  %v3627_v47 = vpack.c.bf16 %v2168_v39, %v2168_v39  ;;  %v974_v48 = vadd.f32 %v3766_v40, %v4366_v6 }
  0xfc   : > { %v1230_v49 = vadd.f32 %v3830_v45, %v4366_v6  ;;  %v966_v50 = vadd.f32 %v4366_v6, %v965_v46  ;;  %v1221_v51 = vpop.f32.mrb[5].mxu1  ;;  %v3767_v52 = vpop.f32.mrb[6].mxu0  ;;  %1974 = vst.msk [vmem:[%s4376_s22 + $0x4] sm:$0xf] %vm1972_vm3, %v3433_v41  ;;  %v3561_v53 = vpack.c.bf16 %v2102_v42, %v2102_v42  ;;  %2038 = vst.msk [vmem:[%s4376_s22 + $0x104] sm:$0xf] %vm1972_vm3, %v3497_v43 }
  0xfd   : > { %v3625_v54 = vpack.c.bf16 %v2166_v44, %v2166_v44  ;;  %v1222_v55 = vadd.f32 %v4366_v6, %v1221_v51  ;;  %v977_v56 = vadd.f32 %v3767_v52, %v4366_v6  ;;  %v3831_v57 = vpop.f32.mrb[6].mxu1  ;;  %v968_v58 = vpop.f32.mrb[7].mxu0  ;;  %2808 = vst.msk [vmem:[%s4387_s24 + $0x10c] sm:$0xf] %vm1972_vm3, %v3627_v47  ;;  %v3438_v59 = vpack.c.bf16 %v974_v48, %v974_v48 }
  0xfe   : > { %v2107_v60 = vmax.f32 %v974_v48, 0.0  ;;  %v3502_v61 = vpack.c.bf16 %v1230_v49, %v1230_v49  ;;  %v2171_v62 = vmax.f32 %v1230_v49, 0.0  ;;  %v1224_v63 = vpop.f32.mrb[7].mxu1  ;;  %2742 = vst.msk [vmem:[%s4387_s24 + $0x4] sm:$0xf] %vm1972_vm3, %v3561_v53  ;;  %v3436_v0 = vpack.c.bf16 %v966_v50, %v966_v50 }
  0xff   : > { %2806 = vst.msk [vmem:[%s4387_s24 + $0x104] sm:$0xf] %vm1972_vm3, %v3625_v54  ;;  %v2105_v1 = vmax.f32 %v966_v50, 0.0  ;;  %v3500_v2 = vpack.c.bf16 %v1222_v55, %v1222_v55  ;;  %v2169_v3 = vmax.f32 %v1222_v55, 0.0  ;;  %1979 = vst.msk [vmem:[%s4376_s22 + $0x18] sm:$0xf] %vm1972_vm3, %v3438_v59  ;;  %v3439_v7 = vpack.c.bf16 %v977_v56, %v977_v56 }
 0x100   : > { %v3566_v4 = vpack.c.bf16 %v2107_v60, %v2107_v60  ;;  %2043 = vst.msk [vmem:[%s4376_s22 + $0x118] sm:$0xf] %vm1972_vm3, %v3502_v61  ;;  %v3630_v5 = vpack.c.bf16 %v2171_v62, %v2171_v62  ;;  %v2108_v8 = vmax.f32 %v977_v56, 0.0  ;;  %1977 = vst.msk [vmem:[%s4376_s22 + $0x10] sm:$0xf] %vm1972_vm3, %v3436_v0  ;;  %v1233_v11 = vadd.f32 %v3831_v57, %v4366_v6 }
 0x101   : > { %v3564_v9 = vpack.c.bf16 %v2105_v1, %v2105_v1  ;;  %2041 = vst.msk [vmem:[%s4376_s22 + $0x110] sm:$0xf] %vm1972_vm3, %v3500_v2  ;;  %v3628_v10 = vpack.c.bf16 %v2169_v3, %v2169_v3  ;;  %v969_v12 = vadd.f32 %v4366_v6, %v968_v58  ;;  %1980 = vst.msk [vmem:[%s4376_s22 + $0x1c] sm:$0xf] %vm1972_vm3, %v3439_v7  ;;  %v3770_v15 = vpop.f32.mrb[8].mxu0 }
 0x102   : > { %2747 = vst.msk [vmem:[%s4387_s24 + $0x18] sm:$0xf] %vm1972_vm3, %v3566_v4  ;;  %2811 = vst.msk [vmem:[%s4387_s24 + $0x118] sm:$0xf] %vm1972_vm3, %v3630_v5  ;;  %v3567_v13 = vpack.c.bf16 %v2108_v8, %v2108_v8  ;;  %v1225_v14 = vadd.f32 %v4366_v6, %v1224_v63  ;;  %v3503_v16 = vpack.c.bf16 %v1233_v11, %v1233_v11  ;;  %v2172_v17 = vmax.f32 %v1233_v11, 0.0  ;;  %v3834_v20 = vpop.f32.mrb[8].mxu1 }
 0x103   : > { %2745 = vst.msk [vmem:[%s4387_s24 + $0x10] sm:$0xf] %vm1972_vm3, %v3564_v9  ;;  %2809 = vst.msk [vmem:[%s4387_s24 + $0x110] sm:$0xf] %vm1972_vm3, %v3628_v10  ;;  %v3437_v18 = vpack.c.bf16 %v969_v12, %v969_v12  ;;  %v2106_v19 = vmax.f32 %v969_v12, 0.0  ;;  %v981_v21 = vpop.f32.mrb[9].mxu0  ;;  %v990_v24 = vadd.f32 %v3770_v15, %v4366_v6  ;;  %v1246_v25 = vadd.f32 %v3834_v20, %v4366_v6 }
 0x104   : > { %2748 = vst.msk [vmem:[%s4387_s24 + $0x1c] sm:$0xf] %vm1972_vm3, %v3567_v13  ;;  %v3501_v22 = vpack.c.bf16 %v1225_v14, %v1225_v14  ;;  %v2170_v23 = vmax.f32 %v1225_v14, 0.0  ;;  %v1237_v26 = vpop.f32.mrb[9].mxu1  ;;  %v3771_v27 = vpop.f32.mrb[10].mxu0  ;;  %v3631_v28 = vpack.c.bf16 %v2172_v17, %v2172_v17  ;;  %v982_v30 = vadd.f32 %v4366_v6, %v981_v21 }
 0x105   : > { %2044 = vst.msk [vmem:[%s4376_s22 + $0x11c] sm:$0xf] %vm1972_vm3, %v3503_v16  ;;  %1978 = vst.msk [vmem:[%s4376_s22 + $0x14] sm:$0xf] %vm1972_vm3, %v3437_v18  ;;  %v3565_v29 = vpack.c.bf16 %v2106_v19, %v2106_v19  ;;  %v1238_v31 = vadd.f32 %v4366_v6, %v1237_v26  ;;  %v3835_v32 = vpop.f32.mrb[10].mxu1  ;;  %v984_v33 = vpop.f32.mrb[11].mxu0  ;;  %v3442_v35 = vpack.c.bf16 %v990_v24, %v990_v24 }
 0x106   : > { %2042 = vst.msk [vmem:[%s4376_s22 + $0x114] sm:$0xf] %vm1972_vm3, %v3501_v22  ;;  %v3629_v34 = vpack.c.bf16 %v2170_v23, %v2170_v23  ;;  %v2111_v36 = vmax.f32 %v990_v24, 0.0  ;;  %v3506_v37 = vpack.c.bf16 %v1246_v25, %v1246_v25  ;;  %v1240_v38 = vpop.f32.mrb[11].mxu1  ;;  %2812 = vst.msk [vmem:[%s4387_s24 + $0x11c] sm:$0xf] %vm1972_vm3, %v3631_v28  ;;  %v3440_v40 = vpack.c.bf16 %v982_v30, %v982_v30 }
 0x107   : > { %2746 = vst.msk [vmem:[%s4387_s24 + $0x14] sm:$0xf] %vm1972_vm3, %v3565_v29  ;;  %v2175_v39 = vmax.f32 %v1246_v25, 0.0  ;;  %v2109_v41 = vmax.f32 %v982_v30, 0.0  ;;  %v3504_v42 = vpack.c.bf16 %v1238_v31, %v1238_v31  ;;  %1983 = vst.msk [vmem:[%s4376_s22 + $0x28] sm:$0xf] %vm1972_vm3, %v3442_v35  ;;  %v993_v45 = vadd.f32 %v3771_v27, %v4366_v6 }
 0x108   : > { %2810 = vst.msk [vmem:[%s4387_s24 + $0x114] sm:$0xf] %vm1972_vm3, %v3629_v34  ;;  %v3570_v43 = vpack.c.bf16 %v2111_v36, %v2111_v36  ;;  %2047 = vst.msk [vmem:[%s4376_s22 + $0x128] sm:$0xf] %vm1972_vm3, %v3506_v37  ;;  %v2173_v44 = vmax.f32 %v1238_v31, 0.0  ;;  %v1249_v46 = vadd.f32 %v3835_v32, %v4366_v6  ;;  %v985_v49 = vadd.f32 %v4366_v6, %v984_v33 }
 0x109   : > { %v3634_v47 = vpack.c.bf16 %v2175_v39, %v2175_v39  ;;  %1981 = vst.msk [vmem:[%s4376_s22 + $0x20] sm:$0xf] %vm1972_vm3, %v3440_v40  ;;  %v3568_v48 = vpack.c.bf16 %v2109_v41, %v2109_v41  ;;  %2045 = vst.msk [vmem:[%s4376_s22 + $0x120] sm:$0xf] %vm1972_vm3, %v3504_v42  ;;  %v1241_v50 = vadd.f32 %v4366_v6, %v1240_v38  ;;  %v2112_v53 = vmax.f32 %v993_v45, 0.0  ;;  %v3774_v55 = vpop.f32.mrb[12].mxu0 }
 0x10a   : > { %2751 = vst.msk [vmem:[%s4387_s24 + $0x28] sm:$0xf] %vm1972_vm3, %v3570_v43  ;;  %v3632_v51 = vpack.c.bf16 %v2173_v44, %v2173_v44  ;;  %v3443_v52 = vpack.c.bf16 %v993_v45, %v993_v45  ;;  %v3507_v54 = vpack.c.bf16 %v1249_v46, %v1249_v46  ;;  %v2176_v56 = vmax.f32 %v1249_v46, 0.0  ;;  %v3838_v60 = vpop.f32.mrb[12].mxu1  ;;  %v997_v61 = vpop.f32.mrb[13].mxu0 }
 0x10b   : > { %2815 = vst.msk [vmem:[%s4387_s24 + $0x128] sm:$0xf] %vm1972_vm3, %v3634_v47  ;;  %2749 = vst.msk [vmem:[%s4387_s24 + $0x20] sm:$0xf] %vm1972_vm3, %v3568_v48  ;;  %v3441_v57 = vpack.c.bf16 %v985_v49, %v985_v49  ;;  %v2110_v58 = vmax.f32 %v985_v49, 0.0  ;;  %v3505_v59 = vpack.c.bf16 %v1241_v50, %v1241_v50  ;;  %v3571_v62 = vpack.c.bf16 %v2112_v53, %v2112_v53  ;;  %v1253_v2 = vpop.f32.mrb[13].mxu1 }
 0x10c   : > { %2813 = vst.msk [vmem:[%s4387_s24 + $0x120] sm:$0xf] %vm1972_vm3, %v3632_v51  ;;  %1984 = vst.msk [vmem:[%s4376_s22 + $0x2c] sm:$0xf] %vm1972_vm3, %v3443_v52  ;;  %v2174_v63 = vmax.f32 %v1241_v50, 0.0  ;;  %v1006_v0 = vadd.f32 %v3774_v55, %v4366_v6  ;;  %v1262_v1 = vadd.f32 %v3838_v60, %v4366_v6  ;;  %v3775_v3 = vpop.f32.mrb[14].mxu0  ;;  %v3635_v4 = vpack.c.bf16 %v2176_v56, %v2176_v56 }
 0x10d   : > { %2048 = vst.msk [vmem:[%s4376_s22 + $0x12c] sm:$0xf] %vm1972_vm3, %v3507_v54  ;;  %1982 = vst.msk [vmem:[%s4376_s22 + $0x24] sm:$0xf] %vm1972_vm3, %v3441_v57  ;;  %v3569_v5 = vpack.c.bf16 %v2110_v58, %v2110_v58  ;;  %v998_v7 = vadd.f32 %v4366_v6, %v997_v61  ;;  %v1254_v8 = vadd.f32 %v4366_v6, %v1253_v2  ;;  %v3839_v9 = vpop.f32.mrb[14].mxu1  ;;  %v1000_v10 = vpop.f32.mrb[15].mxu0 }
 0x10e   : > { %2046 = vst.msk [vmem:[%s4376_s22 + $0x124] sm:$0xf] %vm1972_vm3, %v3505_v59  ;;  %2752 = vst.msk [vmem:[%s4387_s24 + $0x2c] sm:$0xf] %vm1972_vm3, %v3571_v62  ;;  %v3633_v11 = vpack.c.bf16 %v2174_v63, %v2174_v63  ;;  %v3446_v12 = vpack.c.bf16 %v1006_v0, %v1006_v0  ;;  %v2115_v13 = vmax.f32 %v1006_v0, 0.0  ;;  %v3510_v14 = vpack.c.bf16 %v1262_v1, %v1262_v1  ;;  %v1256_v15 = vpop.f32.mrb[15].mxu1 }
 0x10f   : > { %2816 = vst.msk [vmem:[%s4387_s24 + $0x12c] sm:$0xf] %vm1972_vm3, %v3635_v4  ;;  %2750 = vst.msk [vmem:[%s4387_s24 + $0x24] sm:$0xf] %vm1972_vm3, %v3569_v5  ;;  %v2179_v16 = vmax.f32 %v1262_v1, 0.0  ;;  %v3444_v17 = vpack.c.bf16 %v998_v7, %v998_v7  ;;  %v2113_v18 = vmax.f32 %v998_v7, 0.0  ;;  %v3508_v19 = vpack.c.bf16 %v1254_v8, %v1254_v8 }
 0x110   : > { %2814 = vst.msk [vmem:[%s4387_s24 + $0x124] sm:$0xf] %vm1972_vm3, %v3633_v11  ;;  %1987 = vst.msk [vmem:[%s4376_s22 + $0x38] sm:$0xf] %vm1972_vm3, %v3446_v12  ;;  %v3574_v20 = vpack.c.bf16 %v2115_v13, %v2115_v13  ;;  %v2177_v21 = vmax.f32 %v1254_v8, 0.0  ;;  %v1009_v22 = vadd.f32 %v3775_v3, %v4366_v6  ;;  %v1265_v23 = vadd.f32 %v3839_v9, %v4366_v6 }
 0x111   : > { %2051 = vst.msk [vmem:[%s4376_s22 + $0x138] sm:$0xf] %vm1972_vm3, %v3510_v14  ;;  %v3638_v24 = vpack.c.bf16 %v2179_v16, %v2179_v16  ;;  %1985 = vst.msk [vmem:[%s4376_s22 + $0x30] sm:$0xf] %vm1972_vm3, %v3444_v17  ;;  %v3572_v25 = vpack.c.bf16 %v2113_v18, %v2113_v18  ;;  %v1001_v26 = vadd.f32 %v4366_v6, %v1000_v10  ;;  %v3778_v32 = vpop.f32.mrb[16].mxu0 }
 0x112   : > { %2049 = vst.msk [vmem:[%s4376_s22 + $0x130] sm:$0xf] %vm1972_vm3, %v3508_v19  ;;  %v1257_v27 = vadd.f32 %v4366_v6, %v1256_v15  ;;  %2755 = vst.msk [vmem:[%s4387_s24 + $0x38] sm:$0xf] %vm1972_vm3, %v3574_v20  ;;  %v3636_v28 = vpack.c.bf16 %v2177_v21, %v2177_v21  ;;  %v3447_v29 = vpack.c.bf16 %v1009_v22, %v1009_v22  ;;  %v2116_v30 = vmax.f32 %v1009_v22, 0.0  ;;  %v3842_v37 = vpop.f32.mrb[16].mxu1 }
 0x113   : > { %v3511_v31 = vpack.c.bf16 %v1265_v23, %v1265_v23  ;;  %2819 = vst.msk [vmem:[%s4387_s24 + $0x138] sm:$0xf] %vm1972_vm3, %v3638_v24  ;;  %2753 = vst.msk [vmem:[%s4387_s24 + $0x30] sm:$0xf] %vm1972_vm3, %v3572_v25  ;;  %v2180_v33 = vmax.f32 %v1265_v23, 0.0  ;;  %v3445_v34 = vpack.c.bf16 %v1001_v26, %v1001_v26  ;;  %v2114_v35 = vmax.f32 %v1001_v26, 0.0 }
 0x114   : > { %v3509_v36 = vpack.c.bf16 %v1257_v27, %v1257_v27  ;;  %v1013_v38 = vpop.f32.mrb[17].mxu0  ;;  %2817 = vst.msk [vmem:[%s4387_s24 + $0x130] sm:$0xf] %vm1972_vm3, %v3636_v28  ;;  %1988 = vst.msk [vmem:[%s4376_s22 + $0x3c] sm:$0xf] %vm1972_vm3, %v3447_v29  ;;  %v3575_v39 = vpack.c.bf16 %v2116_v30, %v2116_v30  ;;  %v2178_v40 = vmax.f32 %v1257_v27, 0.0  ;;  %v1022_v41 = vadd.f32 %v3778_v32, %v4366_v6 }
 0x115   : > { %2052 = vst.msk [vmem:[%s4376_s22 + $0x13c] sm:$0xf] %vm1972_vm3, %v3511_v31  ;;  %v1278_v42 = vadd.f32 %v3842_v37, %v4366_v6  ;;  %v1269_v43 = vpop.f32.mrb[17].mxu1  ;;  %v3779_v44 = vpop.f32.mrb[18].mxu0  ;;  %v3639_v45 = vpack.c.bf16 %v2180_v33, %v2180_v33  ;;  %1986 = vst.msk [vmem:[%s4376_s22 + $0x34] sm:$0xf] %vm1972_vm3, %v3445_v34  ;;  %v3573_v46 = vpack.c.bf16 %v2114_v35, %v2114_v35 }
 0x116   : > { %2050 = vst.msk [vmem:[%s4376_s22 + $0x134] sm:$0xf] %vm1972_vm3, %v3509_v36  ;;  %v1014_v47 = vadd.f32 %v4366_v6, %v1013_v38  ;;  %v1270_v48 = vadd.f32 %v4366_v6, %v1269_v43  ;;  %v3843_v49 = vpop.f32.mrb[18].mxu1  ;;  %v1016_v50 = vpop.f32.mrb[19].mxu0  ;;  %2756 = vst.msk [vmem:[%s4387_s24 + $0x3c] sm:$0xf] %vm1972_vm3, %v3575_v39  ;;  %v3637_v51 = vpack.c.bf16 %v2178_v40, %v2178_v40 }
 0x117   : > { %v3450_v52 = vpack.c.bf16 %v1022_v41, %v1022_v41  ;;  %v2119_v53 = vmax.f32 %v1022_v41, 0.0  ;;  %v3514_v54 = vpack.c.bf16 %v1278_v42, %v1278_v42  ;;  %v1272_v55 = vpop.f32.mrb[19].mxu1  ;;  %2820 = vst.msk [vmem:[%s4387_s24 + $0x13c] sm:$0xf] %vm1972_vm3, %v3639_v45  ;;  %2754 = vst.msk [vmem:[%s4387_s24 + $0x34] sm:$0xf] %vm1972_vm3, %v3573_v46  ;;  %v1025_v62 = vadd.f32 %v3779_v44, %v4366_v6 }
 0x118   : > { %v2183_v56 = vmax.f32 %v1278_v42, 0.0  ;;  %v3448_v57 = vpack.c.bf16 %v1014_v47, %v1014_v47  ;;  %v2117_v58 = vmax.f32 %v1014_v47, 0.0  ;;  %v3512_v59 = vpack.c.bf16 %v1270_v48, %v1270_v48  ;;  %2818 = vst.msk [vmem:[%s4387_s24 + $0x134] sm:$0xf] %vm1972_vm3, %v3637_v51 }
 0x119   : > { %1991 = vst.msk [vmem:[%s4376_s22 + $0x48] sm:$0xf] %vm1972_vm3, %v3450_v52  ;;  %v3578_v60 = vpack.c.bf16 %v2119_v53, %v2119_v53  ;;  %2055 = vst.msk [vmem:[%s4376_s22 + $0x148] sm:$0xf] %vm1972_vm3, %v3514_v54  ;;  %v2181_v61 = vmax.f32 %v1270_v48, 0.0  ;;  %v1281_v63 = vadd.f32 %v3843_v49, %v4366_v6  ;;  %v1017_v2 = vadd.f32 %v4366_v6, %v1016_v50  ;;  %v3782_v9 = vpop.f32.mrb[20].mxu0 }
 0x11a   : > { %v3642_v0 = vpack.c.bf16 %v2183_v56, %v2183_v56  ;;  %1989 = vst.msk [vmem:[%s4376_s22 + $0x40] sm:$0xf] %vm1972_vm3, %v3448_v57  ;;  %v3576_v1 = vpack.c.bf16 %v2117_v58, %v2117_v58  ;;  %2053 = vst.msk [vmem:[%s4376_s22 + $0x140] sm:$0xf] %vm1972_vm3, %v3512_v59  ;;  %v1273_v3 = vadd.f32 %v4366_v6, %v1272_v55  ;;  %v2120_v7 = vmax.f32 %v1025_v62, 0.0  ;;  %v3846_v14 = vpop.f32.mrb[20].mxu1 }
 0x11b   : > { %2759 = vst.msk [vmem:[%s4387_s24 + $0x48] sm:$0xf] %vm1972_vm3, %v3578_v60  ;;  %v3640_v4 = vpack.c.bf16 %v2181_v61, %v2181_v61  ;;  %v3451_v5 = vpack.c.bf16 %v1025_v62, %v1025_v62  ;;  %v3515_v8 = vpack.c.bf16 %v1281_v63, %v1281_v63  ;;  %v2184_v10 = vmax.f32 %v1281_v63, 0.0  ;;  %v1029_v15 = vpop.f32.mrb[21].mxu0  ;;  %v1285_v20 = vpop.f32.mrb[21].mxu1 }
 0x11c   : > { %2823 = vst.msk [vmem:[%s4387_s24 + $0x148] sm:$0xf] %vm1972_vm3, %v3642_v0  ;;  %2757 = vst.msk [vmem:[%s4387_s24 + $0x40] sm:$0xf] %vm1972_vm3, %v3576_v1  ;;  %v3449_v11 = vpack.c.bf16 %v1017_v2, %v1017_v2  ;;  %v2118_v12 = vmax.f32 %v1017_v2, 0.0  ;;  %v3513_v13 = vpack.c.bf16 %v1273_v3, %v1273_v3  ;;  %v3579_v16 = vpack.c.bf16 %v2120_v7, %v2120_v7  ;;  %v3783_v21 = vpop.f32.mrb[22].mxu0 }
 0x11d   : > { %2821 = vst.msk [vmem:[%s4387_s24 + $0x140] sm:$0xf] %vm1972_vm3, %v3640_v4  ;;  %1992 = vst.msk [vmem:[%s4376_s22 + $0x4c] sm:$0xf] %vm1972_vm3, %v3451_v5  ;;  %v2182_v17 = vmax.f32 %v1273_v3, 0.0  ;;  %v1038_v18 = vadd.f32 %v3782_v9, %v4366_v6  ;;  %v1294_v19 = vadd.f32 %v3846_v14, %v4366_v6  ;;  %v3643_v22 = vpack.c.bf16 %v2184_v10, %v2184_v10  ;;  %v3847_v26 = vpop.f32.mrb[22].mxu1 }
 0x11e   : > { %2056 = vst.msk [vmem:[%s4376_s22 + $0x14c] sm:$0xf] %vm1972_vm3, %v3515_v8  ;;  %1990 = vst.msk [vmem:[%s4376_s22 + $0x44] sm:$0xf] %vm1972_vm3, %v3449_v11  ;;  %v3577_v23 = vpack.c.bf16 %v2118_v12, %v2118_v12  ;;  %v1030_v24 = vadd.f32 %v4366_v6, %v1029_v15  ;;  %v1286_v25 = vadd.f32 %v4366_v6, %v1285_v20  ;;  %v1032_v27 = vpop.f32.mrb[23].mxu0  ;;  %v1288_v32 = vpop.f32.mrb[23].mxu1 }
 0x11f   : > { %2054 = vst.msk [vmem:[%s4376_s22 + $0x144] sm:$0xf] %vm1972_vm3, %v3513_v13  ;;  %2760 = vst.msk [vmem:[%s4387_s24 + $0x4c] sm:$0xf] %vm1972_vm3, %v3579_v16  ;;  %v3641_v28 = vpack.c.bf16 %v2182_v17, %v2182_v17  ;;  %v3454_v29 = vpack.c.bf16 %v1038_v18, %v1038_v18  ;;  %v2123_v30 = vmax.f32 %v1038_v18, 0.0  ;;  %v3518_v31 = vpack.c.bf16 %v1294_v19, %v1294_v19 }
 0x120   : > { %2824 = vst.msk [vmem:[%s4387_s24 + $0x14c] sm:$0xf] %vm1972_vm3, %v3643_v22  ;;  %2758 = vst.msk [vmem:[%s4387_s24 + $0x44] sm:$0xf] %vm1972_vm3, %v3577_v23  ;;  %v2187_v33 = vmax.f32 %v1294_v19, 0.0  ;;  %v3452_v34 = vpack.c.bf16 %v1030_v24, %v1030_v24  ;;  %v2121_v35 = vmax.f32 %v1030_v24, 0.0  ;;  %v3516_v36 = vpack.c.bf16 %v1286_v25, %v1286_v25 }
 0x121   : > { %2822 = vst.msk [vmem:[%s4387_s24 + $0x144] sm:$0xf] %vm1972_vm3, %v3641_v28  ;;  %1995 = vst.msk [vmem:[%s4376_s22 + $0x58] sm:$0xf] %vm1972_vm3, %v3454_v29  ;;  %v3582_v37 = vpack.c.bf16 %v2123_v30, %v2123_v30  ;;  %v2185_v38 = vmax.f32 %v1286_v25, 0.0  ;;  %v1041_v39 = vadd.f32 %v3783_v21, %v4366_v6  ;;  %v1297_v40 = vadd.f32 %v3847_v26, %v4366_v6  ;;  %v3786_v49 = vpop.f32.mrb[24].mxu0 }
 0x122   : > { %2059 = vst.msk [vmem:[%s4376_s22 + $0x158] sm:$0xf] %vm1972_vm3, %v3518_v31  ;;  %v3646_v41 = vpack.c.bf16 %v2187_v33, %v2187_v33  ;;  %1993 = vst.msk [vmem:[%s4376_s22 + $0x50] sm:$0xf] %vm1972_vm3, %v3452_v34  ;;  %v3580_v42 = vpack.c.bf16 %v2121_v35, %v2121_v35  ;;  %v1033_v43 = vadd.f32 %v4366_v6, %v1032_v27  ;;  %v3850_v54 = vpop.f32.mrb[24].mxu1  ;;  %v1045_v55 = vpop.f32.mrb[25].mxu0 }
 0x123   : > { %2057 = vst.msk [vmem:[%s4376_s22 + $0x150] sm:$0xf] %vm1972_vm3, %v3516_v36  ;;  %v1289_v44 = vadd.f32 %v4366_v6, %v1288_v32  ;;  %2763 = vst.msk [vmem:[%s4387_s24 + $0x58] sm:$0xf] %vm1972_vm3, %v3582_v37  ;;  %v3644_v45 = vpack.c.bf16 %v2185_v38, %v2185_v38  ;;  %v3455_v46 = vpack.c.bf16 %v1041_v39, %v1041_v39  ;;  %v2124_v47 = vmax.f32 %v1041_v39, 0.0  ;;  %v1301_v60 = vpop.f32.mrb[25].mxu1 }
 0x124   : > { %v3519_v48 = vpack.c.bf16 %v1297_v40, %v1297_v40  ;;  %2827 = vst.msk [vmem:[%s4387_s24 + $0x158] sm:$0xf] %vm1972_vm3, %v3646_v41  ;;  %2761 = vst.msk [vmem:[%s4387_s24 + $0x50] sm:$0xf] %vm1972_vm3, %v3580_v42  ;;  %v2188_v50 = vmax.f32 %v1297_v40, 0.0  ;;  %v3453_v51 = vpack.c.bf16 %v1033_v43, %v1033_v43  ;;  %v2122_v52 = vmax.f32 %v1033_v43, 0.0 }
 0x125   : > { %v3517_v53 = vpack.c.bf16 %v1289_v44, %v1289_v44  ;;  %2825 = vst.msk [vmem:[%s4387_s24 + $0x150] sm:$0xf] %vm1972_vm3, %v3644_v45  ;;  %1996 = vst.msk [vmem:[%s4376_s22 + $0x5c] sm:$0xf] %vm1972_vm3, %v3455_v46  ;;  %v3583_v56 = vpack.c.bf16 %v2124_v47, %v2124_v47  ;;  %v2186_v57 = vmax.f32 %v1289_v44, 0.0  ;;  %v1054_v58 = vadd.f32 %v3786_v49, %v4366_v6  ;;  %v3787_v61 = vpop.f32.mrb[26].mxu0 }
 0x126   : > { %2060 = vst.msk [vmem:[%s4376_s22 + $0x15c] sm:$0xf] %vm1972_vm3, %v3519_v48  ;;  %v1310_v59 = vadd.f32 %v3850_v54, %v4366_v6  ;;  %v3647_v62 = vpack.c.bf16 %v2188_v50, %v2188_v50  ;;  %1994 = vst.msk [vmem:[%s4376_s22 + $0x54] sm:$0xf] %vm1972_vm3, %v3453_v51  ;;  %v3581_v63 = vpack.c.bf16 %v2122_v52, %v2122_v52  ;;  %v3851_v2 = vpop.f32.mrb[26].mxu1  ;;  %v1048_v3 = vpop.f32.mrb[27].mxu0 }
 0x127   : > { %2058 = vst.msk [vmem:[%s4376_s22 + $0x154] sm:$0xf] %vm1972_vm3, %v3517_v53  ;;  %v1046_v0 = vadd.f32 %v4366_v6, %v1045_v55  ;;  %v1302_v1 = vadd.f32 %v4366_v6, %v1301_v60  ;;  %2764 = vst.msk [vmem:[%s4387_s24 + $0x5c] sm:$0xf] %vm1972_vm3, %v3583_v56  ;;  %v3645_v4 = vpack.c.bf16 %v2186_v57, %v2186_v57  ;;  %v2127_v7 = vmax.f32 %v1054_v58, 0.0  ;;  %v1304_v9 = vpop.f32.mrb[27].mxu1 }
 0x128   : > { %v3458_v5 = vpack.c.bf16 %v1054_v58, %v1054_v58  ;;  %v3522_v8 = vpack.c.bf16 %v1310_v59, %v1310_v59  ;;  %2828 = vst.msk [vmem:[%s4387_s24 + $0x15c] sm:$0xf] %vm1972_vm3, %v3647_v62  ;;  %2762 = vst.msk [vmem:[%s4387_s24 + $0x54] sm:$0xf] %vm1972_vm3, %v3581_v63  ;;  %v2191_v10 = vmax.f32 %v1310_v59, 0.0  ;;  %v1057_v16 = vadd.f32 %v3787_v61, %v4366_v6 }
 0x129   : > { %v3456_v11 = vpack.c.bf16 %v1046_v0, %v1046_v0  ;;  %v2125_v12 = vmax.f32 %v1046_v0, 0.0  ;;  %v3520_v13 = vpack.c.bf16 %v1302_v1, %v1302_v1  ;;  %2826 = vst.msk [vmem:[%s4387_s24 + $0x154] sm:$0xf] %vm1972_vm3, %v3645_v4  ;;  %v3586_v14 = vpack.c.bf16 %v2127_v7, %v2127_v7  ;;  %v3790_v26 = vpop.f32.mrb[28].mxu0 }
 0x12a   : > { %1999 = vst.msk [vmem:[%s4376_s22 + $0x68] sm:$0xf] %vm1972_vm3, %v3458_v5  ;;  %2063 = vst.msk [vmem:[%s4376_s22 + $0x168] sm:$0xf] %vm1972_vm3, %v3522_v8  ;;  %v2189_v15 = vmax.f32 %v1302_v1, 0.0  ;;  %v1313_v17 = vadd.f32 %v3851_v2, %v4366_v6  ;;  %v3650_v18 = vpack.c.bf16 %v2191_v10, %v2191_v10  ;;  %v1049_v20 = vadd.f32 %v4366_v6, %v1048_v3  ;;  %v3854_v31 = vpop.f32.mrb[28].mxu1 }
 0x12b   : > { %1997 = vst.msk [vmem:[%s4376_s22 + $0x60] sm:$0xf] %vm1972_vm3, %v3456_v11  ;;  %v3584_v19 = vpack.c.bf16 %v2125_v12, %v2125_v12  ;;  %2061 = vst.msk [vmem:[%s4376_s22 + $0x160] sm:$0xf] %vm1972_vm3, %v3520_v13  ;;  %v1305_v21 = vadd.f32 %v4366_v6, %v1304_v9  ;;  %v3459_v23 = vpack.c.bf16 %v1057_v16, %v1057_v16  ;;  %v2128_v24 = vmax.f32 %v1057_v16, 0.0  ;;  %v1061_v32 = vpop.f32.mrb[29].mxu0 }
 0x12c   : > { %2767 = vst.msk [vmem:[%s4387_s24 + $0x68] sm:$0xf] %vm1972_vm3, %v3586_v14  ;;  %v3648_v22 = vpack.c.bf16 %v2189_v15, %v2189_v15  ;;  %v3523_v25 = vpack.c.bf16 %v1313_v17, %v1313_v17  ;;  %2831 = vst.msk [vmem:[%s4387_s24 + $0x168] sm:$0xf] %vm1972_vm3, %v3650_v18  ;;  %v2192_v27 = vmax.f32 %v1313_v17, 0.0  ;;  %v3457_v28 = vpack.c.bf16 %v1049_v20, %v1049_v20  ;;  %v1317_v37 = vpop.f32.mrb[29].mxu1 }
 0x12d   : > { %2765 = vst.msk [vmem:[%s4387_s24 + $0x60] sm:$0xf] %vm1972_vm3, %v3584_v19  ;;  %v2126_v29 = vmax.f32 %v1049_v20, 0.0  ;;  %v3521_v30 = vpack.c.bf16 %v1305_v21, %v1305_v21  ;;  %2000 = vst.msk [vmem:[%s4376_s22 + $0x6c] sm:$0xf] %vm1972_vm3, %v3459_v23  ;;  %v3587_v33 = vpack.c.bf16 %v2128_v24, %v2128_v24  ;;  %v2190_v34 = vmax.f32 %v1305_v21, 0.0 }
 0x12e   : > { %2829 = vst.msk [vmem:[%s4387_s24 + $0x160] sm:$0xf] %vm1972_vm3, %v3648_v22  ;;  %2064 = vst.msk [vmem:[%s4376_s22 + $0x16c] sm:$0xf] %vm1972_vm3, %v3523_v25  ;;  %v1070_v35 = vadd.f32 %v3790_v26, %v4366_v6  ;;  %v1326_v36 = vadd.f32 %v3854_v31, %v4366_v6  ;;  %v3791_v38 = vpop.f32.mrb[30].mxu0  ;;  %v3651_v39 = vpack.c.bf16 %v2192_v27, %v2192_v27  ;;  %v3855_v43 = vpop.f32.mrb[30].mxu1 }
 0x12f   : > { %1998 = vst.msk [vmem:[%s4376_s22 + $0x64] sm:$0xf] %vm1972_vm3, %v3457_v28  ;;  %v3585_v40 = vpack.c.bf16 %v2126_v29, %v2126_v29  ;;  %2062 = vst.msk [vmem:[%s4376_s22 + $0x164] sm:$0xf] %vm1972_vm3, %v3521_v30  ;;  %v1062_v41 = vadd.f32 %v4366_v6, %v1061_v32  ;;  %v1318_v42 = vadd.f32 %v4366_v6, %v1317_v37  ;;  %v1064_v44 = vpop.f32.mrb[31].mxu0  ;;  %v1320_v49 = vpop.f32.mrb[31].mxu1 }
 0x130   : > { %2768 = vst.msk [vmem:[%s4387_s24 + $0x6c] sm:$0xf] %vm1972_vm3, %v3587_v33  ;;  %v3649_v45 = vpack.c.bf16 %v2190_v34, %v2190_v34  ;;  %v3462_v46 = vpack.c.bf16 %v1070_v35, %v1070_v35  ;;  %v2131_v47 = vmax.f32 %v1070_v35, 0.0  ;;  %v3526_v48 = vpack.c.bf16 %v1326_v36, %v1326_v36  ;;  %2832 = vst.msk [vmem:[%s4387_s24 + $0x16c] sm:$0xf] %vm1972_vm3, %v3651_v39 }
 0x131   : > { %2766 = vst.msk [vmem:[%s4387_s24 + $0x64] sm:$0xf] %vm1972_vm3, %v3585_v40  ;;  %v2195_v50 = vmax.f32 %v1326_v36, 0.0  ;;  %v3460_v51 = vpack.c.bf16 %v1062_v41, %v1062_v41  ;;  %v2129_v52 = vmax.f32 %v1062_v41, 0.0  ;;  %v3524_v53 = vpack.c.bf16 %v1318_v42, %v1318_v42  ;;  %v3794_v2 = vpop.f32.mrb[32].mxu0 }
 0x132   : > { %2830 = vst.msk [vmem:[%s4387_s24 + $0x164] sm:$0xf] %vm1972_vm3, %v3649_v45  ;;  %2003 = vst.msk [vmem:[%s4376_s22 + $0x78] sm:$0xf] %vm1972_vm3, %v3462_v46  ;;  %v3590_v54 = vpack.c.bf16 %v2131_v47, %v2131_v47  ;;  %v2193_v55 = vmax.f32 %v1318_v42, 0.0  ;;  %v1073_v56 = vadd.f32 %v3791_v38, %v4366_v6  ;;  %v1329_v57 = vadd.f32 %v3855_v43, %v4366_v6  ;;  %v3858_v8 = vpop.f32.mrb[32].mxu1 }
 0x133   : > { %2067 = vst.msk [vmem:[%s4376_s22 + $0x178] sm:$0xf] %vm1972_vm3, %v3526_v48  ;;  %v3654_v58 = vpack.c.bf16 %v2195_v50, %v2195_v50  ;;  %2001 = vst.msk [vmem:[%s4376_s22 + $0x70] sm:$0xf] %vm1972_vm3, %v3460_v51  ;;  %v3588_v59 = vpack.c.bf16 %v2129_v52, %v2129_v52  ;;  %v1065_v60 = vadd.f32 %v4366_v6, %v1064_v44  ;;  %v1077_v9 = vpop.f32.mrb[33].mxu0  ;;  %v1333_v14 = vpop.f32.mrb[33].mxu1 }
 0x134   : > { %2065 = vst.msk [vmem:[%s4376_s22 + $0x170] sm:$0xf] %vm1972_vm3, %v3524_v53  ;;  %v1321_v61 = vadd.f32 %v4366_v6, %v1320_v49  ;;  %2771 = vst.msk [vmem:[%s4387_s24 + $0x78] sm:$0xf] %vm1972_vm3, %v3590_v54  ;;  %v3652_v62 = vpack.c.bf16 %v2193_v55, %v2193_v55  ;;  %v3463_v63 = vpack.c.bf16 %v1073_v56, %v1073_v56  ;;  %v2132_v0 = vmax.f32 %v1073_v56, 0.0  ;;  %v3795_v15 = vpop.f32.mrb[34].mxu0 }
 0x135   : > { %v3527_v1 = vpack.c.bf16 %v1329_v57, %v1329_v57  ;;  %2835 = vst.msk [vmem:[%s4387_s24 + $0x178] sm:$0xf] %vm1972_vm3, %v3654_v58  ;;  %2769 = vst.msk [vmem:[%s4387_s24 + $0x70] sm:$0xf] %vm1972_vm3, %v3588_v59  ;;  %v2196_v3 = vmax.f32 %v1329_v57, 0.0  ;;  %v3461_v4 = vpack.c.bf16 %v1065_v60, %v1065_v60  ;;  %v2130_v5 = vmax.f32 %v1065_v60, 0.0 }
 0x136   : > { %v3525_v7 = vpack.c.bf16 %v1321_v61, %v1321_v61  ;;  %2833 = vst.msk [vmem:[%s4387_s24 + $0x170] sm:$0xf] %vm1972_vm3, %v3652_v62  ;;  %2004 = vst.msk [vmem:[%s4376_s22 + $0x7c] sm:$0xf] %vm1972_vm3, %v3463_v63  ;;  %v3591_v10 = vpack.c.bf16 %v2132_v0, %v2132_v0  ;;  %v2194_v11 = vmax.f32 %v1321_v61, 0.0  ;;  %v1086_v12 = vadd.f32 %v3794_v2, %v4366_v6  ;;  %v3859_v20 = vpop.f32.mrb[34].mxu1 }
 0x137   : > { %2068 = vst.msk [vmem:[%s4376_s22 + $0x17c] sm:$0xf] %vm1972_vm3, %v3527_v1  ;;  %v1342_v13 = vadd.f32 %v3858_v8, %v4366_v6  ;;  %v3655_v16 = vpack.c.bf16 %v2196_v3, %v2196_v3  ;;  %2002 = vst.msk [vmem:[%s4376_s22 + $0x74] sm:$0xf] %vm1972_vm3, %v3461_v4  ;;  %v3589_v17 = vpack.c.bf16 %v2130_v5, %v2130_v5  ;;  %v1080_v21 = vpop.f32.mrb[35].mxu0  ;;  %v1336_v26 = vpop.f32.mrb[35].mxu1 }
 0x138   : > { %2066 = vst.msk [vmem:[%s4376_s22 + $0x174] sm:$0xf] %vm1972_vm3, %v3525_v7  ;;  %v1078_v18 = vadd.f32 %v4366_v6, %v1077_v9  ;;  %v1334_v19 = vadd.f32 %v4366_v6, %v1333_v14  ;;  %2772 = vst.msk [vmem:[%s4387_s24 + $0x7c] sm:$0xf] %vm1972_vm3, %v3591_v10  ;;  %v3653_v22 = vpack.c.bf16 %v2194_v11, %v2194_v11  ;;  %v2135_v24 = vmax.f32 %v1086_v12, 0.0 }
 0x139   : > { %v3466_v23 = vpack.c.bf16 %v1086_v12, %v1086_v12  ;;  %v3530_v25 = vpack.c.bf16 %v1342_v13, %v1342_v13  ;;  %2836 = vst.msk [vmem:[%s4387_s24 + $0x17c] sm:$0xf] %vm1972_vm3, %v3655_v16  ;;  %2770 = vst.msk [vmem:[%s4387_s24 + $0x74] sm:$0xf] %vm1972_vm3, %v3589_v17  ;;  %v2199_v27 = vmax.f32 %v1342_v13, 0.0  ;;  %v1089_v33 = vadd.f32 %v3795_v15, %v4366_v6  ;;  %v3798_v43 = vpop.f32.mrb[36].mxu0 }
 0x13a   : > { %v3464_v28 = vpack.c.bf16 %v1078_v18, %v1078_v18  ;;  %v2133_v29 = vmax.f32 %v1078_v18, 0.0  ;;  %v3528_v30 = vpack.c.bf16 %v1334_v19, %v1334_v19  ;;  %2834 = vst.msk [vmem:[%s4387_s24 + $0x174] sm:$0xf] %vm1972_vm3, %v3653_v22  ;;  %v3594_v31 = vpack.c.bf16 %v2135_v24, %v2135_v24  ;;  %v3862_v48 = vpop.f32.mrb[36].mxu1  ;;  %v1093_v49 = vpop.f32.mrb[37].mxu0 }
 0x13b   : > { %2007 = vst.msk [vmem:[%s4376_s22 + $0x88] sm:$0xf] %vm1972_vm3, %v3466_v23  ;;  %2071 = vst.msk [vmem:[%s4376_s22 + $0x188] sm:$0xf] %vm1972_vm3, %v3530_v25  ;;  %v2197_v32 = vmax.f32 %v1334_v19, 0.0  ;;  %v1345_v34 = vadd.f32 %v3859_v20, %v4366_v6  ;;  %v3658_v35 = vpack.c.bf16 %v2199_v27, %v2199_v27  ;;  %v1081_v37 = vadd.f32 %v4366_v6, %v1080_v21  ;;  %v1349_v54 = vpop.f32.mrb[37].mxu1 }
 0x13c   : > { %2005 = vst.msk [vmem:[%s4376_s22 + $0x80] sm:$0xf] %vm1972_vm3, %v3464_v28  ;;  %v3592_v36 = vpack.c.bf16 %v2133_v29, %v2133_v29  ;;  %2069 = vst.msk [vmem:[%s4376_s22 + $0x180] sm:$0xf] %vm1972_vm3, %v3528_v30  ;;  %v1337_v38 = vadd.f32 %v4366_v6, %v1336_v26  ;;  %v3467_v40 = vpack.c.bf16 %v1089_v33, %v1089_v33  ;;  %v2136_v41 = vmax.f32 %v1089_v33, 0.0  ;;  %v3799_v55 = vpop.f32.mrb[38].mxu0 }
 0x13d   : > { %2775 = vst.msk [vmem:[%s4387_s24 + $0x88] sm:$0xf] %vm1972_vm3, %v3594_v31  ;;  %v3656_v39 = vpack.c.bf16 %v2197_v32, %v2197_v32  ;;  %v3531_v42 = vpack.c.bf16 %v1345_v34, %v1345_v34  ;;  %2839 = vst.msk [vmem:[%s4387_s24 + $0x188] sm:$0xf] %vm1972_vm3, %v3658_v35  ;;  %v2200_v44 = vmax.f32 %v1345_v34, 0.0  ;;  %v3465_v45 = vpack.c.bf16 %v1081_v37, %v1081_v37  ;;  %v3863_v61 = vpop.f32.mrb[38].mxu1 }
 0x13e   : > { %2773 = vst.msk [vmem:[%s4387_s24 + $0x80] sm:$0xf] %vm1972_vm3, %v3592_v36  ;;  %v2134_v46 = vmax.f32 %v1081_v37, 0.0  ;;  %v3529_v47 = vpack.c.bf16 %v1337_v38, %v1337_v38  ;;  %2008 = vst.msk [vmem:[%s4376_s22 + $0x8c] sm:$0xf] %vm1972_vm3, %v3467_v40  ;;  %v3595_v50 = vpack.c.bf16 %v2136_v41, %v2136_v41  ;;  %v2198_v51 = vmax.f32 %v1337_v38, 0.0 }
 0x13f   : > { %2837 = vst.msk [vmem:[%s4387_s24 + $0x180] sm:$0xf] %vm1972_vm3, %v3656_v39  ;;  %2072 = vst.msk [vmem:[%s4376_s22 + $0x18c] sm:$0xf] %vm1972_vm3, %v3531_v42  ;;  %v1102_v52 = vadd.f32 %v3798_v43, %v4366_v6  ;;  %v1358_v53 = vadd.f32 %v3862_v48, %v4366_v6  ;;  %v3659_v56 = vpack.c.bf16 %v2200_v44, %v2200_v44  ;;  %v4735_v59 = vld [vmem:[%s5121_s2] ss:$0 sm:$0xff] }
 0x140   : > { %2006 = vst.msk [vmem:[%s4376_s22 + $0x84] sm:$0xf] %vm1972_vm3, %v3465_v45  ;;  %v3593_v57 = vpack.c.bf16 %v2134_v46, %v2134_v46  ;;  %2070 = vst.msk [vmem:[%s4376_s22 + $0x184] sm:$0xf] %vm1972_vm3, %v3529_v47  ;;  %v1094_v58 = vadd.f32 %v4366_v6, %v1093_v49  ;;  %v1350_v60 = vadd.f32 %v4735_v59, %v1349_v54  ;;  %v1096_v62 = vpop.f32.mrb[39].mxu0  ;;  %v1352_v6 = vpop.f32.mrb[39].mxu1 }
 0x141   : > { %2776 = vst.msk [vmem:[%s4387_s24 + $0x8c] sm:$0xf] %vm1972_vm3, %v3595_v50  ;;  %v3657_v63 = vpack.c.bf16 %v2198_v51, %v2198_v51  ;;  %v3470_v0 = vpack.c.bf16 %v1102_v52, %v1102_v52  ;;  %v2139_v1 = vmax.f32 %v1102_v52, 0.0  ;;  %v3534_v2 = vpack.c.bf16 %v1358_v53, %v1358_v53  ;;  %2840 = vst.msk [vmem:[%s4387_s24 + $0x18c] sm:$0xf] %vm1972_vm3, %v3659_v56  ;;  %v3802_v20 = vpop.f32.mrb[40].mxu0 }
 0x142   : > { %2774 = vst.msk [vmem:[%s4387_s24 + $0x84] sm:$0xf] %vm1972_vm3, %v3593_v57  ;;  %v2203_v3 = vmax.f32 %v1358_v53, 0.0  ;;  %v3468_v4 = vpack.c.bf16 %v1094_v58, %v1094_v58  ;;  %v2137_v5 = vmax.f32 %v1094_v58, 0.0  ;;  %v3532_v7 = vpack.c.bf16 %v1350_v60, %v1350_v60  ;;  %v3866_v25 = vpop.f32.mrb[40].mxu1  ;;  %v1109_v26 = vpop.f32.mrb[41].mxu0 }
 0x143   : > { %2838 = vst.msk [vmem:[%s4387_s24 + $0x184] sm:$0xf] %vm1972_vm3, %v3657_v63  ;;  %2011 = vst.msk [vmem:[%s4376_s22 + $0x98] sm:$0xf] %vm1972_vm3, %v3470_v0  ;;  %v3598_v8 = vpack.c.bf16 %v2139_v1, %v2139_v1  ;;  %v2201_v9 = vmax.f32 %v1350_v60, 0.0  ;;  %v1105_v10 = vadd.f32 %v4735_v59, %v3799_v55  ;;  %v1361_v11 = vadd.f32 %v4735_v59, %v3863_v61  ;;  %v1365_v31 = vpop.f32.mrb[41].mxu1 }
 0x144   : > { %2075 = vst.msk [vmem:[%s4376_s22 + $0x198] sm:$0xf] %vm1972_vm3, %v3534_v2  ;;  %v3662_v12 = vpack.c.bf16 %v2203_v3, %v2203_v3  ;;  %2009 = vst.msk [vmem:[%s4376_s22 + $0x90] sm:$0xf] %vm1972_vm3, %v3468_v4  ;;  %v3596_v13 = vpack.c.bf16 %v2137_v5, %v2137_v5  ;;  %v1097_v14 = vadd.f32 %v4735_v59, %v1096_v62  ;;  %v3803_v32 = vpop.f32.mrb[42].mxu0  ;;  %v3867_v37 = vpop.f32.mrb[42].mxu1 }
 0x145   : > { %2073 = vst.msk [vmem:[%s4376_s22 + $0x190] sm:$0xf] %vm1972_vm3, %v3532_v7  ;;  %v1353_v15 = vadd.f32 %v4735_v59, %v1352_v6  ;;  %2779 = vst.msk [vmem:[%s4387_s24 + $0x98] sm:$0xf] %vm1972_vm3, %v3598_v8  ;;  %v3660_v16 = vpack.c.bf16 %v2201_v9, %v2201_v9  ;;  %v3471_v17 = vpack.c.bf16 %v1105_v10, %v1105_v10  ;;  %v2140_v18 = vmax.f32 %v1105_v10, 0.0  ;;  %v1112_v38 = vpop.f32.mrb[43].mxu0 }
 0x146   : > { %v3535_v19 = vpack.c.bf16 %v1361_v11, %v1361_v11  ;;  %2843 = vst.msk [vmem:[%s4387_s24 + $0x198] sm:$0xf] %vm1972_vm3, %v3662_v12  ;;  %2777 = vst.msk [vmem:[%s4387_s24 + $0x90] sm:$0xf] %vm1972_vm3, %v3596_v13  ;;  %v2204_v21 = vmax.f32 %v1361_v11, 0.0  ;;  %v3469_v22 = vpack.c.bf16 %v1097_v14, %v1097_v14  ;;  %v2138_v23 = vmax.f32 %v1097_v14, 0.0 }
 0x147   : > { %v3533_v24 = vpack.c.bf16 %v1353_v15, %v1353_v15  ;;  %2841 = vst.msk [vmem:[%s4387_s24 + $0x190] sm:$0xf] %vm1972_vm3, %v3660_v16  ;;  %2012 = vst.msk [vmem:[%s4376_s22 + $0x9c] sm:$0xf] %vm1972_vm3, %v3471_v17  ;;  %v3599_v27 = vpack.c.bf16 %v2140_v18, %v2140_v18  ;;  %v2202_v28 = vmax.f32 %v1353_v15, 0.0  ;;  %v1118_v29 = vadd.f32 %v4735_v59, %v3802_v20  ;;  %v1368_v43 = vpop.f32.mrb[43].mxu1 }
 0x148   : > { %2076 = vst.msk [vmem:[%s4376_s22 + $0x19c] sm:$0xf] %vm1972_vm3, %v3535_v19  ;;  %v1374_v30 = vadd.f32 %v4735_v59, %v3866_v25  ;;  %v3663_v33 = vpack.c.bf16 %v2204_v21, %v2204_v21  ;;  %2010 = vst.msk [vmem:[%s4376_s22 + $0x94] sm:$0xf] %vm1972_vm3, %v3469_v22  ;;  %v3597_v34 = vpack.c.bf16 %v2138_v23, %v2138_v23 }
 0x149   : > { %2074 = vst.msk [vmem:[%s4376_s22 + $0x194] sm:$0xf] %vm1972_vm3, %v3533_v24  ;;  %v1110_v35 = vadd.f32 %v4735_v59, %v1109_v26  ;;  %v1366_v36 = vadd.f32 %v4735_v59, %v1365_v31  ;;  %2780 = vst.msk [vmem:[%s4387_s24 + $0x9c] sm:$0xf] %vm1972_vm3, %v3599_v27  ;;  %v3661_v39 = vpack.c.bf16 %v2202_v28, %v2202_v28  ;;  %v2143_v41 = vmax.f32 %v1118_v29, 0.0  ;;  %v3806_v61 = vpop.f32.mrb[44].mxu0 }
 0x14a   : > { %v3474_v40 = vpack.c.bf16 %v1118_v29, %v1118_v29  ;;  %v3538_v42 = vpack.c.bf16 %v1374_v30, %v1374_v30  ;;  %2844 = vst.msk [vmem:[%s4387_s24 + $0x19c] sm:$0xf] %vm1972_vm3, %v3663_v33  ;;  %2778 = vst.msk [vmem:[%s4387_s24 + $0x94] sm:$0xf] %vm1972_vm3, %v3597_v34  ;;  %v2207_v44 = vmax.f32 %v1374_v30, 0.0  ;;  %v1121_v50 = vadd.f32 %v4735_v59, %v3803_v32  ;;  %v3870_v2 = vpop.f32.mrb[44].mxu1 }
 0x14b   : > { %v3472_v45 = vpack.c.bf16 %v1110_v35, %v1110_v35  ;;  %v2141_v46 = vmax.f32 %v1110_v35, 0.0  ;;  %v3536_v47 = vpack.c.bf16 %v1366_v36, %v1366_v36  ;;  %2842 = vst.msk [vmem:[%s4387_s24 + $0x194] sm:$0xf] %vm1972_vm3, %v3661_v39  ;;  %v3602_v48 = vpack.c.bf16 %v2143_v41, %v2143_v41  ;;  %v1125_v6 = vpop.f32.mrb[45].mxu0  ;;  %v1381_v8 = vpop.f32.mrb[45].mxu1 }
 0x14c   : > { %2015 = vst.msk [vmem:[%s4376_s22 + $0xa8] sm:$0xf] %vm1972_vm3, %v3474_v40  ;;  %2079 = vst.msk [vmem:[%s4376_s22 + $0x1a8] sm:$0xf] %vm1972_vm3, %v3538_v42  ;;  %v2205_v49 = vmax.f32 %v1366_v36, 0.0  ;;  %v1377_v51 = vadd.f32 %v4735_v59, %v3867_v37  ;;  %v3666_v52 = vpack.c.bf16 %v2207_v44, %v2207_v44  ;;  %v1113_v54 = vadd.f32 %v4735_v59, %v1112_v38  ;;  %v3807_v9 = vpop.f32.mrb[46].mxu0 }
 0x14d   : > { %2013 = vst.msk [vmem:[%s4376_s22 + $0xa0] sm:$0xf] %vm1972_vm3, %v3472_v45  ;;  %v3600_v53 = vpack.c.bf16 %v2141_v46, %v2141_v46  ;;  %2077 = vst.msk [vmem:[%s4376_s22 + $0x1a0] sm:$0xf] %vm1972_vm3, %v3536_v47  ;;  %v1369_v55 = vadd.f32 %v4735_v59, %v1368_v43  ;;  %v3475_v57 = vpack.c.bf16 %v1121_v50, %v1121_v50  ;;  %v2144_v58 = vmax.f32 %v1121_v50, 0.0  ;;  %v3871_v14 = vpop.f32.mrb[46].mxu1 }
 0x14e   : > { %2783 = vst.msk [vmem:[%s4387_s24 + $0xa8] sm:$0xf] %vm1972_vm3, %v3602_v48  ;;  %v3664_v56 = vpack.c.bf16 %v2205_v49, %v2205_v49  ;;  %v3539_v60 = vpack.c.bf16 %v1377_v51, %v1377_v51  ;;  %2847 = vst.msk [vmem:[%s4387_s24 + $0x1a8] sm:$0xf] %vm1972_vm3, %v3666_v52  ;;  %v2208_v62 = vmax.f32 %v1377_v51, 0.0  ;;  %v3473_v63 = vpack.c.bf16 %v1113_v54, %v1113_v54  ;;  %v1128_v15 = vpop.f32.mrb[47].mxu0 }
 0x14f   : > { %2781 = vst.msk [vmem:[%s4387_s24 + $0xa0] sm:$0xf] %vm1972_vm3, %v3600_v53  ;;  %v2142_v0 = vmax.f32 %v1113_v54, 0.0  ;;  %v3537_v1 = vpack.c.bf16 %v1369_v55, %v1369_v55  ;;  %2016 = vst.msk [vmem:[%s4376_s22 + $0xac] sm:$0xf] %vm1972_vm3, %v3475_v57  ;;  %v3603_v3 = vpack.c.bf16 %v2144_v58, %v2144_v58  ;;  %v2206_v4 = vmax.f32 %v1369_v55, 0.0 }
 0x150   : > { %2845 = vst.msk [vmem:[%s4387_s24 + $0x1a0] sm:$0xf] %vm1972_vm3, %v3664_v56  ;;  %2080 = vst.msk [vmem:[%s4376_s22 + $0x1ac] sm:$0xf] %vm1972_vm3, %v3539_v60  ;;  %v1134_v5 = vadd.f32 %v4735_v59, %v3806_v61  ;;  %v1390_v7 = vadd.f32 %v4735_v59, %v3870_v2  ;;  %v3667_v10 = vpack.c.bf16 %v2208_v62, %v2208_v62  ;;  %v1384_v20 = vpop.f32.mrb[47].mxu1 }
 0x151   : > { %2014 = vst.msk [vmem:[%s4376_s22 + $0xa4] sm:$0xf] %vm1972_vm3, %v3473_v63  ;;  %v3601_v11 = vpack.c.bf16 %v2142_v0, %v2142_v0  ;;  %2078 = vst.msk [vmem:[%s4376_s22 + $0x1a4] sm:$0xf] %vm1972_vm3, %v3537_v1  ;;  %v1126_v12 = vadd.f32 %v4735_v59, %v1125_v6  ;;  %v1382_v13 = vadd.f32 %v4735_v59, %v1381_v8  ;;  %v3810_v37 = vpop.f32.mrb[48].mxu0 }
 0x152   : > { %2784 = vst.msk [vmem:[%s4387_s24 + $0xac] sm:$0xf] %vm1972_vm3, %v3603_v3  ;;  %v3665_v16 = vpack.c.bf16 %v2206_v4, %v2206_v4  ;;  %v3478_v17 = vpack.c.bf16 %v1134_v5, %v1134_v5  ;;  %v2147_v18 = vmax.f32 %v1134_v5, 0.0  ;;  %v3542_v19 = vpack.c.bf16 %v1390_v7, %v1390_v7  ;;  %2848 = vst.msk [vmem:[%s4387_s24 + $0x1ac] sm:$0xf] %vm1972_vm3, %v3667_v10  ;;  %v3874_v42 = vpop.f32.mrb[48].mxu1 }
 0x153   : > { %2782 = vst.msk [vmem:[%s4387_s24 + $0xa4] sm:$0xf] %vm1972_vm3, %v3601_v11  ;;  %v2211_v21 = vmax.f32 %v1390_v7, 0.0  ;;  %v3476_v22 = vpack.c.bf16 %v1126_v12, %v1126_v12  ;;  %v2145_v23 = vmax.f32 %v1126_v12, 0.0  ;;  %v3540_v24 = vpack.c.bf16 %v1382_v13, %v1382_v13  ;;  %v1141_v43 = vpop.f32.mrb[49].mxu0  ;;  %v1397_v48 = vpop.f32.mrb[49].mxu1 }
 0x154   : > { %2846 = vst.msk [vmem:[%s4387_s24 + $0x1a4] sm:$0xf] %vm1972_vm3, %v3665_v16  ;;  %2019 = vst.msk [vmem:[%s4376_s22 + $0xb8] sm:$0xf] %vm1972_vm3, %v3478_v17  ;;  %v3606_v25 = vpack.c.bf16 %v2147_v18, %v2147_v18  ;;  %v2209_v26 = vmax.f32 %v1382_v13, 0.0  ;;  %v1137_v27 = vadd.f32 %v4735_v59, %v3807_v9  ;;  %v1393_v28 = vadd.f32 %v4735_v59, %v3871_v14  ;;  %v3811_v49 = vpop.f32.mrb[50].mxu0 }
 0x155   : > { %2083 = vst.msk [vmem:[%s4376_s22 + $0x1b8] sm:$0xf] %vm1972_vm3, %v3542_v19  ;;  %v3670_v29 = vpack.c.bf16 %v2211_v21, %v2211_v21  ;;  %2017 = vst.msk [vmem:[%s4376_s22 + $0xb0] sm:$0xf] %vm1972_vm3, %v3476_v22  ;;  %v3604_v30 = vpack.c.bf16 %v2145_v23, %v2145_v23  ;;  %v1129_v31 = vadd.f32 %v4735_v59, %v1128_v15  ;;  %v3875_v54 = vpop.f32.mrb[50].mxu1  ;;  %v1144_v55 = vpop.f32.mrb[51].mxu0 }
 0x156   : > { %2081 = vst.msk [vmem:[%s4376_s22 + $0x1b0] sm:$0xf] %vm1972_vm3, %v3540_v24  ;;  %v1385_v32 = vadd.f32 %v4735_v59, %v1384_v20  ;;  %2787 = vst.msk [vmem:[%s4387_s24 + $0xb8] sm:$0xf] %vm1972_vm3, %v3606_v25  ;;  %v3668_v33 = vpack.c.bf16 %v2209_v26, %v2209_v26  ;;  %v3479_v34 = vpack.c.bf16 %v1137_v27, %v1137_v27  ;;  %v2148_v35 = vmax.f32 %v1137_v27, 0.0  ;;  %v1400_v61 = vpop.f32.mrb[51].mxu1 }
 0x157   : > { %v3543_v36 = vpack.c.bf16 %v1393_v28, %v1393_v28  ;;  %2851 = vst.msk [vmem:[%s4387_s24 + $0x1b8] sm:$0xf] %vm1972_vm3, %v3670_v29  ;;  %2785 = vst.msk [vmem:[%s4387_s24 + $0xb0] sm:$0xf] %vm1972_vm3, %v3604_v30  ;;  %v2212_v38 = vmax.f32 %v1393_v28, 0.0  ;;  %v3477_v39 = vpack.c.bf16 %v1129_v31, %v1129_v31  ;;  %v2146_v40 = vmax.f32 %v1129_v31, 0.0 }
 0x158   : > { %v3541_v41 = vpack.c.bf16 %v1385_v32, %v1385_v32  ;;  %2849 = vst.msk [vmem:[%s4387_s24 + $0x1b0] sm:$0xf] %vm1972_vm3, %v3668_v33  ;;  %2020 = vst.msk [vmem:[%s4376_s22 + $0xbc] sm:$0xf] %vm1972_vm3, %v3479_v34  ;;  %v3607_v44 = vpack.c.bf16 %v2148_v35, %v2148_v35  ;;  %v2210_v45 = vmax.f32 %v1385_v32, 0.0  ;;  %v1150_v46 = vadd.f32 %v4735_v59, %v3810_v37 }
 0x159   : > { %2084 = vst.msk [vmem:[%s4376_s22 + $0x1bc] sm:$0xf] %vm1972_vm3, %v3543_v36  ;;  %v1406_v47 = vadd.f32 %v4735_v59, %v3874_v42  ;;  %v3671_v50 = vpack.c.bf16 %v2212_v38, %v2212_v38  ;;  %2018 = vst.msk [vmem:[%s4376_s22 + $0xb4] sm:$0xf] %vm1972_vm3, %v3477_v39  ;;  %v3605_v51 = vpack.c.bf16 %v2146_v40, %v2146_v40  ;;  %v3814_v14 = vpop.f32.mrb[52].mxu0 }
 0x15a   : > { %2082 = vst.msk [vmem:[%s4376_s22 + $0x1b4] sm:$0xf] %vm1972_vm3, %v3541_v41  ;;  %v1142_v52 = vadd.f32 %v4735_v59, %v1141_v43  ;;  %v1398_v53 = vadd.f32 %v4735_v59, %v1397_v48  ;;  %2788 = vst.msk [vmem:[%s4387_s24 + $0xbc] sm:$0xf] %vm1972_vm3, %v3607_v44  ;;  %v3669_v56 = vpack.c.bf16 %v2210_v45, %v2210_v45  ;;  %v2151_v58 = vmax.f32 %v1150_v46, 0.0  ;;  %v3878_v19 = vpop.f32.mrb[52].mxu1 }
 0x15b   : > { %v3482_v57 = vpack.c.bf16 %v1150_v46, %v1150_v46  ;;  %v3546_v60 = vpack.c.bf16 %v1406_v47, %v1406_v47  ;;  %2852 = vst.msk [vmem:[%s4387_s24 + $0x1bc] sm:$0xf] %vm1972_vm3, %v3671_v50  ;;  %2786 = vst.msk [vmem:[%s4387_s24 + $0xb4] sm:$0xf] %vm1972_vm3, %v3605_v51  ;;  %v2215_v62 = vmax.f32 %v1406_v47, 0.0  ;;  %v1153_v3 = vadd.f32 %v4735_v59, %v3811_v49  ;;  %v1157_v20 = vpop.f32.mrb[53].mxu0 }
 0x15c   : > { %v3480_v63 = vpack.c.bf16 %v1142_v52, %v1142_v52  ;;  %v2149_v0 = vmax.f32 %v1142_v52, 0.0  ;;  %v3544_v1 = vpack.c.bf16 %v1398_v53, %v1398_v53  ;;  %2850 = vst.msk [vmem:[%s4387_s24 + $0x1b4] sm:$0xf] %vm1972_vm3, %v3669_v56  ;;  %v3610_v2 = vpack.c.bf16 %v2151_v58, %v2151_v58  ;;  %v1413_v25 = vpop.f32.mrb[53].mxu1  ;;  %v3815_v26 = vpop.f32.mrb[54].mxu0 }
 0x15d   : > { %2023 = vst.msk [vmem:[%s4376_s22 + $0xc8] sm:$0xf] %vm1972_vm3, %v3482_v57  ;;  %2087 = vst.msk [vmem:[%s4376_s22 + $0x1c8] sm:$0xf] %vm1972_vm3, %v3546_v60  ;;  %v2213_v6 = vmax.f32 %v1398_v53, 0.0  ;;  %v1409_v4 = vadd.f32 %v4735_v59, %v3875_v54  ;;  %v3674_v5 = vpack.c.bf16 %v2215_v62, %v2215_v62  ;;  %v1145_v8 = vadd.f32 %v4735_v59, %v1144_v55  ;;  %v3879_v31 = vpop.f32.mrb[54].mxu1 }
 0x15e   : > { %2021 = vst.msk [vmem:[%s4376_s22 + $0xc0] sm:$0xf] %vm1972_vm3, %v3480_v63  ;;  %v3608_v7 = vpack.c.bf16 %v2149_v0, %v2149_v0  ;;  %2085 = vst.msk [vmem:[%s4376_s22 + $0x1c0] sm:$0xf] %vm1972_vm3, %v3544_v1  ;;  %v1401_v9 = vadd.f32 %v4735_v59, %v1400_v61  ;;  %v3483_v11 = vpack.c.bf16 %v1153_v3, %v1153_v3  ;;  %v2152_v12 = vmax.f32 %v1153_v3, 0.0  ;;  %v1160_v32 = vpop.f32.mrb[55].mxu0 }
 0x15f   : > { %2791 = vst.msk [vmem:[%s4387_s24 + $0xc8] sm:$0xf] %vm1972_vm3, %v3610_v2  ;;  %v3672_v10 = vpack.c.bf16 %v2213_v6, %v2213_v6  ;;  %v3547_v13 = vpack.c.bf16 %v1409_v4, %v1409_v4  ;;  %2855 = vst.msk [vmem:[%s4387_s24 + $0x1c8] sm:$0xf] %vm1972_vm3, %v3674_v5  ;;  %v2216_v15 = vmax.f32 %v1409_v4, 0.0  ;;  %v3481_v16 = vpack.c.bf16 %v1145_v8, %v1145_v8  ;;  %v1416_v37 = vpop.f32.mrb[55].mxu1 }
 0x160   : > { %2789 = vst.msk [vmem:[%s4387_s24 + $0xc0] sm:$0xf] %vm1972_vm3, %v3608_v7  ;;  %v2150_v17 = vmax.f32 %v1145_v8, 0.0  ;;  %v3545_v18 = vpack.c.bf16 %v1401_v9, %v1401_v9  ;;  %2024 = vst.msk [vmem:[%s4376_s22 + $0xcc] sm:$0xf] %vm1972_vm3, %v3483_v11  ;;  %v3611_v21 = vpack.c.bf16 %v2152_v12, %v2152_v12  ;;  %v2214_v22 = vmax.f32 %v1401_v9, 0.0 }
 0x161   : > { %2853 = vst.msk [vmem:[%s4387_s24 + $0x1c0] sm:$0xf] %vm1972_vm3, %v3672_v10  ;;  %2088 = vst.msk [vmem:[%s4376_s22 + $0x1cc] sm:$0xf] %vm1972_vm3, %v3547_v13  ;;  %v1166_v23 = vadd.f32 %v4735_v59, %v3814_v14  ;;  %v1422_v24 = vadd.f32 %v4735_v59, %v3878_v19  ;;  %v3675_v27 = vpack.c.bf16 %v2216_v15, %v2216_v15  ;;  %v3818_v54 = vpop.f32.mrb[56].mxu0 }
 0x162   : > { %2022 = vst.msk [vmem:[%s4376_s22 + $0xc4] sm:$0xf] %vm1972_vm3, %v3481_v16  ;;  %v3609_v28 = vpack.c.bf16 %v2150_v17, %v2150_v17  ;;  %2086 = vst.msk [vmem:[%s4376_s22 + $0x1c4] sm:$0xf] %vm1972_vm3, %v3545_v18  ;;  %v1158_v29 = vadd.f32 %v4735_v59, %v1157_v20  ;;  %v1414_v30 = vadd.f32 %v4735_v59, %v1413_v25  ;;  %v3882_v60 = vpop.f32.mrb[56].mxu1  ;;  %v1173_v61 = vpop.f32.mrb[57].mxu0 }
 0x163   : > { %2792 = vst.msk [vmem:[%s4387_s24 + $0xcc] sm:$0xf] %vm1972_vm3, %v3611_v21  ;;  %v3673_v33 = vpack.c.bf16 %v2214_v22, %v2214_v22  ;;  %v3486_v34 = vpack.c.bf16 %v1166_v23, %v1166_v23  ;;  %v2155_v35 = vmax.f32 %v1166_v23, 0.0  ;;  %v3550_v36 = vpack.c.bf16 %v1422_v24, %v1422_v24  ;;  %2856 = vst.msk [vmem:[%s4387_s24 + $0x1cc] sm:$0xf] %vm1972_vm3, %v3675_v27  ;;  %v1429_v2 = vpop.f32.mrb[57].mxu1 }
 0x164   : > { %2790 = vst.msk [vmem:[%s4387_s24 + $0xc4] sm:$0xf] %vm1972_vm3, %v3609_v28  ;;  %v2219_v38 = vmax.f32 %v1422_v24, 0.0  ;;  %v3484_v39 = vpack.c.bf16 %v1158_v29, %v1158_v29  ;;  %v2153_v40 = vmax.f32 %v1158_v29, 0.0  ;;  %v3548_v41 = vpack.c.bf16 %v1414_v30, %v1414_v30  ;;  %v3819_v6 = vpop.f32.mrb[58].mxu0  ;;  %v3883_v8 = vpop.f32.mrb[58].mxu1 }
 0x165   : > { %2854 = vst.msk [vmem:[%s4387_s24 + $0x1c4] sm:$0xf] %vm1972_vm3, %v3673_v33  ;;  %2027 = vst.msk [vmem:[%s4376_s22 + $0xd8] sm:$0xf] %vm1972_vm3, %v3486_v34  ;;  %v3614_v42 = vpack.c.bf16 %v2155_v35, %v2155_v35  ;;  %v2217_v43 = vmax.f32 %v1414_v30, 0.0  ;;  %v1169_v44 = vadd.f32 %v4735_v59, %v3815_v26  ;;  %v1425_v45 = vadd.f32 %v4735_v59, %v3879_v31  ;;  %v1176_v9 = vpop.f32.mrb[59].mxu0 }
 0x166   : > { %2091 = vst.msk [vmem:[%s4376_s22 + $0x1d8] sm:$0xf] %vm1972_vm3, %v3550_v36  ;;  %v3678_v46 = vpack.c.bf16 %v2219_v38, %v2219_v38  ;;  %2025 = vst.msk [vmem:[%s4376_s22 + $0xd0] sm:$0xf] %vm1972_vm3, %v3484_v39  ;;  %v3612_v47 = vpack.c.bf16 %v2153_v40, %v2153_v40  ;;  %v1161_v48 = vadd.f32 %v4735_v59, %v1160_v32  ;;  %v1432_v14 = vpop.f32.mrb[59].mxu1 }
 0x167   : > { %2089 = vst.msk [vmem:[%s4376_s22 + $0x1d0] sm:$0xf] %vm1972_vm3, %v3548_v41  ;;  %v1417_v49 = vadd.f32 %v4735_v59, %v1416_v37  ;;  %2795 = vst.msk [vmem:[%s4387_s24 + $0xd8] sm:$0xf] %vm1972_vm3, %v3614_v42  ;;  %v3676_v50 = vpack.c.bf16 %v2217_v43, %v2217_v43  ;;  %v3487_v51 = vpack.c.bf16 %v1169_v44, %v1169_v44  ;;  %v2156_v52 = vmax.f32 %v1169_v44, 0.0 }
 0x168   : > { %v3551_v53 = vpack.c.bf16 %v1425_v45, %v1425_v45  ;;  %2859 = vst.msk [vmem:[%s4387_s24 + $0x1d8] sm:$0xf] %vm1972_vm3, %v3678_v46  ;;  %2793 = vst.msk [vmem:[%s4387_s24 + $0xd0] sm:$0xf] %vm1972_vm3, %v3612_v47  ;;  %v2220_v55 = vmax.f32 %v1425_v45, 0.0  ;;  %v3485_v56 = vpack.c.bf16 %v1161_v48, %v1161_v48  ;;  %v2154_v57 = vmax.f32 %v1161_v48, 0.0 }
 0x169   : > { %v3549_v58 = vpack.c.bf16 %v1417_v49, %v1417_v49  ;;  %2857 = vst.msk [vmem:[%s4387_s24 + $0x1d0] sm:$0xf] %vm1972_vm3, %v3676_v50  ;;  %2028 = vst.msk [vmem:[%s4376_s22 + $0xdc] sm:$0xf] %vm1972_vm3, %v3487_v51  ;;  %v3615_v62 = vpack.c.bf16 %v2156_v52, %v2156_v52  ;;  %v2218_v63 = vmax.f32 %v1417_v49, 0.0  ;;  %v1182_v0 = vadd.f32 %v4735_v59, %v3818_v54  ;;  %v3822_v31 = vpop.f32.mrb[60].mxu0 }
 0x16a   : > { %2092 = vst.msk [vmem:[%s4376_s22 + $0x1dc] sm:$0xf] %vm1972_vm3, %v3551_v53  ;;  %v1438_v1 = vadd.f32 %v4735_v59, %v3882_v60  ;;  %v3679_v3 = vpack.c.bf16 %v2220_v55, %v2220_v55  ;;  %2026 = vst.msk [vmem:[%s4376_s22 + $0xd4] sm:$0xf] %vm1972_vm3, %v3485_v56  ;;  %v3613_v4 = vpack.c.bf16 %v2154_v57, %v2154_v57  ;;  %v3886_v36 = vpop.f32.mrb[60].mxu1  ;;  %v1189_v37 = vpop.f32.mrb[61].mxu0 }
 0x16b   : > { %2090 = vst.msk [vmem:[%s4376_s22 + $0x1d4] sm:$0xf] %vm1972_vm3, %v3549_v58  ;;  %v1174_v5 = vadd.f32 %v4735_v59, %v1173_v61  ;;  %v1430_v7 = vadd.f32 %v4735_v59, %v1429_v2  ;;  %2796 = vst.msk [vmem:[%s4387_s24 + $0xdc] sm:$0xf] %vm1972_vm3, %v3615_v62  ;;  %v3677_v10 = vpack.c.bf16 %v2218_v63, %v2218_v63  ;;  %v2159_v12 = vmax.f32 %v1182_v0, 0.0  ;;  %v1445_v42 = vpop.f32.mrb[61].mxu1 }
 0x16c   : > { %v3490_v11 = vpack.c.bf16 %v1182_v0, %v1182_v0  ;;  %v3554_v13 = vpack.c.bf16 %v1438_v1, %v1438_v1  ;;  %2860 = vst.msk [vmem:[%s4387_s24 + $0x1dc] sm:$0xf] %vm1972_vm3, %v3679_v3  ;;  %2794 = vst.msk [vmem:[%s4387_s24 + $0xd4] sm:$0xf] %vm1972_vm3, %v3613_v4  ;;  %v2223_v15 = vmax.f32 %v1438_v1, 0.0  ;;  %v1185_v21 = vadd.f32 %v4735_v59, %v3819_v6  ;;  %v3823_v43 = vpop.f32.mrb[62].mxu0 }
 0x16d   : > { %v3488_v16 = vpack.c.bf16 %v1174_v5, %v1174_v5  ;;  %v2157_v17 = vmax.f32 %v1174_v5, 0.0  ;;  %v3552_v18 = vpack.c.bf16 %v1430_v7, %v1430_v7  ;;  %2858 = vst.msk [vmem:[%s4387_s24 + $0x1d4] sm:$0xf] %vm1972_vm3, %v3677_v10  ;;  %v3618_v19 = vpack.c.bf16 %v2159_v12, %v2159_v12  ;;  %v3887_v48 = vpop.f32.mrb[62].mxu1  ;;  %v1192_v49 = vpop.f32.mrb[63].mxu0 }
 0x16e   : > { %2031 = vst.msk [vmem:[%s4376_s22 + $0xe8] sm:$0xf] %vm1972_vm3, %v3490_v11  ;;  %2095 = vst.msk [vmem:[%s4376_s22 + $0x1e8] sm:$0xf] %vm1972_vm3, %v3554_v13  ;;  %v2221_v20 = vmax.f32 %v1430_v7, 0.0  ;;  %v1441_v22 = vadd.f32 %v4735_v59, %v3883_v8  ;;  %v3682_v23 = vpack.c.bf16 %v2223_v15, %v2223_v15  ;;  %v1177_v25 = vadd.f32 %v4735_v59, %v1176_v9  ;;  %v1448_v54 = vpop.f32.mrb[63].mxu1 }
 0x16f   : > { %2029 = vst.msk [vmem:[%s4376_s22 + $0xe0] sm:$0xf] %vm1972_vm3, %v3488_v16  ;;  %v3616_v24 = vpack.c.bf16 %v2157_v17, %v2157_v17  ;;  %2093 = vst.msk [vmem:[%s4376_s22 + $0x1e0] sm:$0xf] %vm1972_vm3, %v3552_v18  ;;  %v1433_v26 = vadd.f32 %v4735_v59, %v1432_v14  ;;  %v3491_v28 = vpack.c.bf16 %v1185_v21, %v1185_v21  ;;  %v2160_v29 = vmax.f32 %v1185_v21, 0.0 }
 0x170   : > { %2799 = vst.msk [vmem:[%s4387_s24 + $0xe8] sm:$0xf] %vm1972_vm3, %v3618_v19  ;;  %v3680_v27 = vpack.c.bf16 %v2221_v20, %v2221_v20  ;;  %v3555_v30 = vpack.c.bf16 %v1441_v22, %v1441_v22  ;;  %2863 = vst.msk [vmem:[%s4387_s24 + $0x1e8] sm:$0xf] %vm1972_vm3, %v3682_v23  ;;  %v2224_v32 = vmax.f32 %v1441_v22, 0.0  ;;  %v3489_v33 = vpack.c.bf16 %v1177_v25, %v1177_v25 }
 0x171   : > { %2797 = vst.msk [vmem:[%s4387_s24 + $0xe0] sm:$0xf] %vm1972_vm3, %v3616_v24  ;;  %v2158_v34 = vmax.f32 %v1177_v25, 0.0  ;;  %v3553_v35 = vpack.c.bf16 %v1433_v26, %v1433_v26  ;;  %2032 = vst.msk [vmem:[%s4376_s22 + $0xec] sm:$0xf] %vm1972_vm3, %v3491_v28  ;;  %v3619_v38 = vpack.c.bf16 %v2160_v29, %v2160_v29  ;;  %v2222_v39 = vmax.f32 %v1433_v26, 0.0 }
 0x172   : > { %2861 = vst.msk [vmem:[%s4387_s24 + $0x1e0] sm:$0xf] %vm1972_vm3, %v3680_v27  ;;  %2096 = vst.msk [vmem:[%s4376_s22 + $0x1ec] sm:$0xf] %vm1972_vm3, %v3555_v30  ;;  %v1198_v40 = vadd.f32 %v4735_v59, %v3822_v31  ;;  %v1454_v41 = vadd.f32 %v4735_v59, %v3886_v36  ;;  %v3683_v44 = vpack.c.bf16 %v2224_v32, %v2224_v32 }
 0x173   : > { %2030 = vst.msk [vmem:[%s4376_s22 + $0xe4] sm:$0xf] %vm1972_vm3, %v3489_v33  ;;  %v3617_v45 = vpack.c.bf16 %v2158_v34, %v2158_v34  ;;  %2094 = vst.msk [vmem:[%s4376_s22 + $0x1e4] sm:$0xf] %vm1972_vm3, %v3553_v35  ;;  %v1190_v46 = vadd.f32 %v4735_v59, %v1189_v37  ;;  %v1446_v47 = vadd.f32 %v4735_v59, %v1445_v42 }
 0x174   : > { %2800 = vst.msk [vmem:[%s4387_s24 + $0xec] sm:$0xf] %vm1972_vm3, %v3619_v38  ;;  %v3681_v50 = vpack.c.bf16 %v2222_v39, %v2222_v39  ;;  %v3494_v51 = vpack.c.bf16 %v1198_v40, %v1198_v40  ;;  %v2163_v52 = vmax.f32 %v1198_v40, 0.0  ;;  %v3558_v53 = vpack.c.bf16 %v1454_v41, %v1454_v41  ;;  %2864 = vst.msk [vmem:[%s4387_s24 + $0x1ec] sm:$0xf] %vm1972_vm3, %v3683_v44 }
 0x175   : > { %2798 = vst.msk [vmem:[%s4387_s24 + $0xe4] sm:$0xf] %vm1972_vm3, %v3617_v45  ;;  %v2227_v55 = vmax.f32 %v1454_v41, 0.0  ;;  %v3492_v56 = vpack.c.bf16 %v1190_v46, %v1190_v46  ;;  %v2161_v57 = vmax.f32 %v1190_v46, 0.0  ;;  %v3556_v58 = vpack.c.bf16 %v1446_v47, %v1446_v47 }
 0x176   : > { %2862 = vst.msk [vmem:[%s4387_s24 + $0x1e4] sm:$0xf] %vm1972_vm3, %v3681_v50  ;;  %2035 = vst.msk [vmem:[%s4376_s22 + $0xf8] sm:$0xf] %vm1972_vm3, %v3494_v51  ;;  %v3622_v60 = vpack.c.bf16 %v2163_v52, %v2163_v52  ;;  %v2225_v61 = vmax.f32 %v1446_v47, 0.0  ;;  %v1201_v62 = vadd.f32 %v4735_v59, %v3823_v43  ;;  %v1457_v63 = vadd.f32 %v4735_v59, %v3887_v48 }
 0x177   : > { %2099 = vst.msk [vmem:[%s4376_s22 + $0x1f8] sm:$0xf] %vm1972_vm3, %v3558_v53  ;;  %v3686_v0 = vpack.c.bf16 %v2227_v55, %v2227_v55  ;;  %2033 = vst.msk [vmem:[%s4376_s22 + $0xf0] sm:$0xf] %vm1972_vm3, %v3492_v56  ;;  %v3620_v1 = vpack.c.bf16 %v2161_v57, %v2161_v57  ;;  %v1193_v2 = vadd.f32 %v4735_v59, %v1192_v49 }
 0x178   : > { %2097 = vst.msk [vmem:[%s4376_s22 + $0x1f0] sm:$0xf] %vm1972_vm3, %v3556_v58  ;;  %v1449_v6 = vadd.f32 %v4735_v59, %v1448_v54  ;;  %2803 = vst.msk [vmem:[%s4387_s24 + $0xf8] sm:$0xf] %vm1972_vm3, %v3622_v60  ;;  %v3684_v3 = vpack.c.bf16 %v2225_v61, %v2225_v61  ;;  %v3495_v4 = vpack.c.bf16 %v1201_v62, %v1201_v62  ;;  %v2164_v5 = vmax.f32 %v1201_v62, 0.0 }
 0x179   : > { %v3559_v7 = vpack.c.bf16 %v1457_v63, %v1457_v63  ;;  %2867 = vst.msk [vmem:[%s4387_s24 + $0x1f8] sm:$0xf] %vm1972_vm3, %v3686_v0  ;;  %2801 = vst.msk [vmem:[%s4387_s24 + $0xf0] sm:$0xf] %vm1972_vm3, %v3620_v1  ;;  %v2228_v8 = vmax.f32 %v1457_v63, 0.0  ;;  %v3493_v9 = vpack.c.bf16 %v1193_v2, %v1193_v2  ;;  %v2162_v59 = vmax.f32 %v1193_v2, 0.0 }
 0x17a   : > { %v3557_v10 = vpack.c.bf16 %v1449_v6, %v1449_v6  ;;  %2865 = vst.msk [vmem:[%s4387_s24 + $0x1f0] sm:$0xf] %vm1972_vm3, %v3684_v3  ;;  %2036 = vst.msk [vmem:[%s4376_s22 + $0xfc] sm:$0xf] %vm1972_vm3, %v3495_v4  ;;  %v3623_v11 = vpack.c.bf16 %v2164_v5, %v2164_v5  ;;  %v2226_v12 = vmax.f32 %v1449_v6, 0.0 }
 0x17b   : > { %2100 = vst.msk [vmem:[%s4376_s22 + $0x1fc] sm:$0xf] %vm1972_vm3, %v3559_v7  ;;  %v3687_v13 = vpack.c.bf16 %v2228_v8, %v2228_v8  ;;  %2034 = vst.msk [vmem:[%s4376_s22 + $0xf4] sm:$0xf] %vm1972_vm3, %v3493_v9  ;;  %v3621_v14 = vpack.c.bf16 %v2162_v59, %v2162_v59 }
 0x17c   : > { %2098 = vst.msk [vmem:[%s4376_s22 + $0x1f4] sm:$0xf] %vm1972_vm3, %v3557_v10  ;;  %2804 = vst.msk [vmem:[%s4387_s24 + $0xfc] sm:$0xf] %vm1972_vm3, %v3623_v11  ;;  %v3685_v15 = vpack.c.bf16 %v2226_v12, %v2226_v12 }
 0x17d   : > { %4035 = shalt.err (!%p4032_p5)
}
 0x17e   : > { %s4036_s22 = scalar_lea.hbm %s5012_s9, 8192  ;;  %s4040_s8 = scalar_lea.hbm %s5123_s4, 16384 }
 0x17f   : > { %p4037_p6 = scmp.ne.s32.totalorder %s5012_s9, %s4036_s22  ;;  %p4041_p10 = scmp.lt.u32.totalorder %s5012_s9, %s5123_s4 }
 0x180   : > { %p4042_p11 = scmp.lt.u32.totalorder %s4040_s8, %s4036_s22  ;;  %p4044_p13 = scmp.lt.u32.totalorder %s4036_s22, %s5012_s9 }
 0x181   : > { %p4038_p7 = pnand %p4037_p6, %p4204_p4 }
 0x182   : > { %p4043_p12 = por %p4042_p11, %p4041_p10 }
 0x183   : > { %p4039_p9 = pneg %p4038_p7 }
 0x184   : > { %p4045_p0 = por %p4044_p13, %p4043_p12 }
 0x186   : > { %p4046_p1 = pnand %p4045_p0, %p4039_p9 }
 0x188   : > { %4049 = shalt.err (!%p4046_p1)
}
 0x189   : > { %s4136_s21 = smov 64   ;;  %s4137_s26 = smov 4   ;;  %2868 = vst.msk [vmem:[%s4387_s24 + $0x1fc] sm:$0xf] %vm1972_vm3, %v3687_v13  ;;  %2802 = vst.msk [vmem:[%s4387_s24 + $0xf4] sm:$0xf] %vm1972_vm3, %v3621_v14 }
 0x18a   : > { %3893 = dma.vmem_to_hbm [thread:$0]  (%p4204_p4), %s5014_s5, 8192, %s5012_s9, %s2875_s14, %s4136_s21, %s4136_s21, %s4137_s26  }
 0x18b   : > { %2866 = vst.msk [vmem:[%s4387_s24 + $0x1f4] sm:$0xf] %vm1972_vm3, %v3685_v15  ;;  %s2870_s29 = scalar_lea.sflag [#allocation3], %s4361_s12  ;;  %s4050_s18 = scalar_lea.vmem %s5033_s6, 8192 }
 0x18c   : > { %p4051_p2 = scmp.ne.s32.totalorder %s5033_s6, %s4050_s18  ;;  %s4138_s22 = smov [#allocation2]  }
 0x18d   : > { %s4054_s30 = sshll.u32 %s4138_s22, 4  ;;  %s4055_s30 = int_to_ptr.vmem [resolvable:$false] %s4054_s30 }
 0x18e   : > { %p4052_p3 = pnand %p4051_p2, %p4204_p4  ;;  %s4056_s7 = scalar_lea.vmem %s4055_s30, 16384 }
 0x18f   : > { %p4057_p6 = scmp.lt.s32.totalorder %s5033_s6, %s4055_s30  ;;  %p4058_p7 = scmp.lt.s32.totalorder %s4056_s7, %s4050_s18 }
 0x190   : > { %p4053_p5 = pneg %p4052_p3 }
 0x191   : > { %p4059_p9 = por %p4058_p7, %p4057_p6 }
 0x193   : > { %p4060_p10 = pnand %p4059_p9, %p4053_p5 }
 0x195   : > { %4063 = shalt.err (!%p4060_p10)
}
 0x196   : > { %s4064_s24 = scalar_lea.hbm %s5031_s13, 8192  ;;  %s4068_s14 = scalar_lea.hbm %s5122_s3, 16384 }
 0x197   : > { %p4065_p11 = scmp.ne.s32.totalorder %s5031_s13, %s4064_s24  ;;  %p4069_p0 = scmp.lt.u32.totalorder %s5031_s13, %s5122_s3 }
 0x198   : > { %p4070_p1 = scmp.lt.u32.totalorder %s4068_s14, %s4064_s24  ;;  %p4072_p3 = scmp.lt.u32.totalorder %s4064_s24, %s5031_s13 }
 0x199   : > { %p4066_p12 = pnand %p4065_p11, %p4204_p4 }
 0x19a   : > { %p4071_p2 = por %p4070_p1, %p4069_p0 }
 0x19b   : > { %p4067_p13 = pneg %p4066_p12 }
 0x19c   : > { %p4073_p5 = por %p4072_p3, %p4071_p2 }
 0x19e   : > { %p4074_p6 = pnand %p4073_p5, %p4067_p13 }
 0x1a0   : > { %4077 = shalt.err (!%p4074_p6)
}
 0x1a1   : > { %3892 = dma.vmem_to_hbm [thread:$0]  (%p4204_p4), %s5033_s6, 8192, %s5031_s13, %s2870_s29, %s4136_s21, %s4136_s21, %s4137_s26  }
 0x1a2 PF: > { %p3903_p7 = scmp.ge.s32.totalorder %s4132_s20, 2  ;;  %s2925_s11 = sand.u32 1, %s4112_s15  }
 0x1a3   : > { %s2926_s18 = scalar_lea.sflag [#allocation3], %s2925_s11 }
 0x1a4   : > { %p3897_p9 = pnand %p3903_p7, %p4211_p8 }
 0x1a6   : > { %4103 = dma.done.wait (!%p3897_p9), %s2926_s18, 8192  }
 0x1a7   : > { %4105 = vsyncadd (!%p3897_p9), %s2926_s18, 4294959104  ;;  %s2935_s25 = scalar_lea.sflag [#allocation5], %s2925_s11 }
 0x1a8   : > { %4107 = dma.done.wait (!%p3897_p9), %s2935_s25, 8192  }
 0x1a9   : > { %4109 = vsyncadd (!%p3897_p9), %s2935_s25, 4294959104  ;;  %s21_s20 = sadd.s32 1, %s4132_s20   ;;  %s5126_s15 = smov %s4116_s16 }
 0x1aa   : > { %p18_p10 = scmp.ge.s32.totalorder %s21_s20, 4   ;;  %s5127_s16 = smov %s4120_s17 }
 0x1ab   : > { %s5128_s17 = smov %s4217_s28  ;;  %s5129_s18 = smov %s4128_s19 }
 0x1ac   : > { %s5130_s19 = smov %s5132_s23  ;;  %20 = sbr.rel (!%p18_p10) target bundleno = 6 (0x6), region = 84 }
 0x1b3   :  { %2940 = vsyncpa [#allocation3], 1 }
 0x1b4   :  { %2942 = vsyncpa [#allocation3 + $0x1], 1 }
 0x1b5   :  { %2943 = vsyncpa [#allocation5], 1 }
 0x1b6   :  { %2945 = vsyncpa [#allocation5 + $0x1], 1 }

</bundles_post_ra>
